<compile_context>
chip_gen: v7x
topology: tpu7x:2x2x1
jax: 0.10.0
libtpu: 0.0.40
codegen_flags: <defaults>
</compile_context>

<pallas_src>
import functools

import jax
import jax.numpy as jnp
from jax import lax
from jax.experimental import pallas as pl
from jax.experimental.pallas import tpu as pltpu


def _lstm_layer_kernel(T, Bb, I, H, L,
                       x_ref, h0_ref, c0_ref, wih_ref, whh_ref, b_ref,
                       mem_ref, hn_ref, cn_ref, xg_ref):
    """One grid step == one (batch block, layer); time recurrence is an inner fori_loop.

    refs:
      x_ref   (T, Bb, I)       resident input sequence (read at layer 0 only)
      h0_ref  (1, Bb, H)       this layer's initial hidden state
      c0_ref  (1, Bb, H)       this layer's initial cell state
      wih_ref (1, Imax, 4H)    this layer's input weights (zero-padded to Imax rows; 0.5-folded)
      whh_ref (1, H, 4H)       this layer's recurrent weights (0.5-folded)
      b_ref   (1, 1, 4H) f32   this layer's bias (b_ih + b_hh, 0.5-folded)
      mem_ref (T, Bb, H)       resident output sequence (also next layer's input)
      hn_ref/cn_ref (1, Bb, H) this layer's final states
      xg_ref  (T, Bb, 4H)      scratch (activation dtype): precomputed input-gate contributions
    """
    l = pl.program_id(1)
    G = 4 * H

    # ---- Phase 1: batched input projection for all T timesteps (one big GEMM). ----
    b = b_ref[0]                                            # (1, 4H) f32, broadcast once

    @pl.when(l == 0)
    def _():
        inp = x_ref[...].reshape(T * Bb, I)                 # (T*Bb, I)
        w = wih_ref[0, :I, :]                               # (I, 4H)
        xg_ref[...] = (
            jnp.dot(inp, w, preferred_element_type=jnp.float32) + b
        ).reshape(T, Bb, G).astype(xg_ref.dtype)

    if L > 1:
        @pl.when(l > 0)
        def _():
            # Previous layer's full output sequence lives in the resident output block.
            inp = mem_ref[...].reshape(T * Bb, H)           # (T*Bb, H)
            w = wih_ref[0, :H, :]                           # (H, 4H)
            xg_ref[...] = (
                jnp.dot(inp, w, preferred_element_type=jnp.float32) + b
            ).reshape(T, Bb, G).astype(xg_ref.dtype)

    # ---- Phase 2: sequential time recurrence; only h @ Whh remains in the loop. ----
    whh = whh_ref[0]                                        # (H, 4H) hoisted load
    h0 = h0_ref[0]                                          # (Bb, H), matmul/activation dtype
    c0 = c0_ref[0].astype(jnp.float32)                      # (Bb, H) f32 carry

    def step(t, carry):
        h, c = carry
        # xg (activation dtype) + f32 MXU accumulation promotes to f32.
        gates = xg_ref[t] + jnp.dot(h, whh, preferred_element_type=jnp.float32)  # (Bb, 4H)
        # 0.5 scale of i/f/o pre-activations is folded into the weights/bias, so a single
        # wide tanh over the whole 4H block is the only EUP push for the gates:
        #   sigmoid(z) = 0.5 * (tanh(z/2) + 1).
        t_all = jnp.tanh(gates)
        i_g = t_all[:, 0 * H:1 * H] * 0.5 + 0.5
        f_g = t_all[:, 1 * H:2 * H] * 0.5 + 0.5
        g_g = t_all[:, 2 * H:3 * H]
        o_g = t_all[:, 3 * H:4 * H] * 0.5 + 0.5
        c_new = f_g * c + i_g * g_g
        h_new = (o_g * jnp.tanh(c_new)).astype(mem_ref.dtype)   # single cast per step
        mem_ref[t] = h_new                                      # this layer's output at t
        return (h_new, c_new)

    h_fin, c_fin = lax.fori_loop(0, T, step, (h0, c0), unroll=min(T, 8))

    # Per-layer final states (hn/cn output blocks are indexed by layer & batch block).
    hn_ref[0] = h_fin.astype(hn_ref.dtype)
    cn_ref[0] = c_fin.astype(cn_ref.dtype)


def lstm_forward(x, h0, c0, params, *, dropout=0.0, bidirectional=False):
    """Single-direction multi-layer LSTM (batch_first=False).

    x:       (T, B, input_size)
    h0, c0:  (num_layers, B, hidden) or None (zeros)
    params:  list of (wih_T (I_l, 4H), whh_T (H, 4H), b (1, 4H)) per layer
    returns: memorys (T, B, H), (hn, cn) each (num_layers, B, H)
    """
    if dropout != 0.0:
        raise NotImplementedError("inter-layer dropout (p>0) not implemented")
    if bidirectional:
        raise NotImplementedError("bidirectional path not implemented")

    T, B, I = x.shape
    L = len(params)
    H = params[0][1].shape[0]
    dtype = x.dtype

    if h0 is None:
        h0 = jnp.zeros((L, B, H), dtype)
    if c0 is None:
        c0 = jnp.zeros((L, B, H), dtype)
    h0 = h0.astype(dtype)
    c0 = c0.astype(dtype)

    # Fold the 0.5 pre-scale of the i/f/o gates into the weights/bias (exact power-of-2
    # scaling) so the kernel does one wide tanh per step.
    gate_scale = jnp.concatenate([
        jnp.full((H,), 0.5, jnp.float32),   # i
        jnp.full((H,), 0.5, jnp.float32),   # f
        jnp.ones((H,), jnp.float32),        # g (plain tanh)
        jnp.full((H,), 0.5, jnp.float32),   # o
    ])

    # Stack per-layer weights (zero-pad layer-0 Wih rows to a common Imax) so a single
    # BlockSpec streams exactly one layer's weights per grid step.
    Imax = max(I, H)
    wih_s = jnp.stack([
        jnp.pad((wih.astype(jnp.float32) * gate_scale).astype(dtype),
                ((0, Imax - wih.shape[0]), (0, 0)))
        for (wih, _, _) in params])                                       # (L, Imax, 4H)
    whh_s = jnp.stack([(whh.astype(jnp.float32) * gate_scale).astype(dtype)
                       for (_, whh, _) in params])                        # (L, H, 4H)
    # Bias kept in f32 (tiny) for free precision.
    b_s = jnp.stack([(jnp.reshape(b, (1, 4 * H)).astype(jnp.float32) * gate_scale)
                     for (_, _, b) in params])                            # (L, 1, 4H) f32

    # Batch-block "parallel" axis: 2 blocks when B splits into >=8-row sublane-aligned
    # halves (feeds v7x's two TensorCores; harmless single block otherwise).
    nb = 2 if (B % 16 == 0) else 1
    Bb = B // nb

    # Generation-aware VMEM limit (~85% of physical per-core VMEM).
    try:
        vmem_limit = int(pltpu.get_tpu_info().vmem_capacity_bytes * 0.85)
    except Exception:
        vmem_limit = 64 * 1024 * 1024

    kernel = functools.partial(_lstm_layer_kernel, T, Bb, I, H, L)

    grid_spec = pltpu.PrefetchScalarGridSpec(
        num_scalar_prefetch=0,
        grid=(nb, L),
        in_specs=[
            pl.BlockSpec((T, Bb, I), lambda b, l: (0, b, 0)),          # x (resident; layer 0 only)
            pl.BlockSpec((1, Bb, H), lambda b, l: (l, b, 0)),          # h0[l]
            pl.BlockSpec((1, Bb, H), lambda b, l: (l, b, 0)),          # c0[l]
            pl.BlockSpec((1, Imax, 4 * H), lambda b, l: (l, 0, 0)),    # wih[l] (streamed)
            pl.BlockSpec((1, H, 4 * H), lambda b, l: (l, 0, 0)),       # whh[l] (streamed)
            pl.BlockSpec((1, 1, 4 * H), lambda b, l: (l, 0, 0)),       # bias[l] (f32)
        ],
        out_specs=[
            pl.BlockSpec((T, Bb, H), lambda b, l: (0, b, 0)),          # memorys (resident across layers)
            pl.BlockSpec((1, Bb, H), lambda b, l: (l, b, 0)),          # hn[l]
            pl.BlockSpec((1, Bb, H), lambda b, l: (l, b, 0)),          # cn[l]
        ],
        scratch_shapes=[
            pltpu.VMEM((T, Bb, 4 * H), dtype),                         # precomputed input gates
        ],
    )

    out_shape = [
        jax.ShapeDtypeStruct((T, B, H), dtype),
        jax.ShapeDtypeStruct((L, B, H), dtype),
        jax.ShapeDtypeStruct((L, B, H), dtype),
    ]

    itemsize = jnp.dtype(dtype).itemsize
    flops = 2 * T * B * 4 * H * (I + (L - 1) * H + L * H)
    transcendentals = 5 * T * B * H * L
    bytes_accessed = (
        (x.size + wih_s.size + whh_s.size + h0.size + c0.size) * itemsize
        + b_s.size * 4
        + (T * B * H + 2 * L * B * H) * itemsize)

    mem, hn, cn = pl.pallas_call(
        kernel,
        out_shape=out_shape,
        grid_spec=grid_spec,
        compiler_params=pltpu.CompilerParams(
            # batch blocks are independent ("parallel"); layers are a true sequential
            # dependence through the resident mem block ("arbitrary").
            dimension_semantics=("parallel", "arbitrary"),
            vmem_limit_bytes=vmem_limit,
        ),
        cost_estimate=pl.CostEstimate(
            flops=flops,
            transcendentals=transcendentals,
            bytes_accessed=bytes_accessed,
        ),
    )(x, h0, c0, wih_s, whh_s, b_s)
    return mem, (hn, cn)


def lstm_ref(x, h0, c0, params):
    """Pure-JAX reference mirroring PyTorch nn.LSTMCell stacked over layers/time."""
    T = x.shape[0]
    L, _, H = h0.shape
    h = [h0[l] for l in range(L)]
    c = [c0[l] for l in range(L)]
    mems = []
    for t in range(T):
        xin = x[t]
        for l, (wih, whh, b) in enumerate(params):
            gates = xin @ wih + h[l] @ whh + b
            i_g = jax.nn.sigmoid(gates[:, 0 * H:1 * H])
            f_g = jax.nn.sigmoid(gates[:, 1 * H:2 * H])
            g_g = jnp.tanh(gates[:, 2 * H:3 * H])
            o_g = jax.nn.sigmoid(gates[:, 3 * H:4 * H])
            c[l] = f_g * c[l] + i_g * g_g
            h[l] = o_g * jnp.tanh(c[l])
            xin = h[l]
        mems.append(xin)
    return jnp.stack(mems), (jnp.stack(h), jnp.stack(c))


def init_params(key, input_size, hidden_size, num_layers):
    """PyTorch-style uniform(-1/sqrt(H), 1/sqrt(H)) init; biases b_ih+b_hh pre-summed."""
    params = []
    k = 1.0 / jnp.sqrt(hidden_size)
    in_dim = input_size
    for _ in range(num_layers):
        key, k1, k2, k3, k4 = jax.random.split(key, 5)
        wih = jax.random.uniform(k1, (in_dim, 4 * hidden_size), jnp.float32, -k, k)
        whh = jax.random.uniform(k2, (hidden_size, 4 * hidden_size), jnp.float32, -k, k)
        b_ih = jax.random.uniform(k3, (4 * hidden_size,), jnp.float32, -k, k)
        b_hh = jax.random.uniform(k4, (4 * hidden_size,), jnp.float32, -k, k)
        params.append((wih, whh, (b_ih + b_hh).reshape(1, 4 * hidden_size)))
        in_dim = hidden_size
    return params


if __name__ == "__main__":
    # Small demo shapes. B is a multiple of 8 (sublane-aligned) per shape discipline.
    T, B = 8, 8
    input_size, hidden_size, num_layers = 16, 32, 2

    key = jax.random.PRNGKey(0)
    key, kx, kh, kc, kp = jax.random.split(key, 5)
    x = jax.random.normal(kx, (T, B, input_size), jnp.float32)
    h0 = jax.random.normal(kh, (num_layers, B, hidden_size), jnp.float32)
    c0 = jax.random.normal(kc, (num_layers, B, hidden_size), jnp.float32)
    params = init_params(kp, input_size, hidden_size, num_layers)

    mem, (hn, cn) = lstm_forward(x, h0, c0, params)
    jax.block_until_ready((mem, hn, cn))

    mem_r, (hn_r, cn_r) = lstm_ref(x, h0, c0, params)
    assert jnp.allclose(mem, mem_r, atol=3e-5, rtol=3e-5), float(jnp.max(jnp.abs(mem - mem_r)))
    assert jnp.allclose(hn, hn_r, atol=3e-5, rtol=3e-5), float(jnp.max(jnp.abs(hn - hn_r)))
    assert jnp.allclose(cn, cn_r, atol=3e-5, rtol=3e-5), float(jnp.max(jnp.abs(cn - cn_r)))

    print("KERNEL_OK")
</pallas_src>

<mosaic_0001>
module attributes {stable_mosaic.version = 11 : i64} {
  func.func @_lstm_layer_kernel(%arg0: i32, %arg1: i32, %arg2: memref<8x8x16xf32, #tpu.memory_space<vmem>>, %arg3: memref<1x8x32xf32, #tpu.memory_space<vmem>>, %arg4: memref<1x8x32xf32, #tpu.memory_space<vmem>>, %arg5: memref<1x32x128xf32, #tpu.memory_space<vmem>>, %arg6: memref<1x32x128xf32, #tpu.memory_space<vmem>>, %arg7: memref<1x1x128xf32, #tpu.memory_space<vmem>>, %arg8: memref<8x8x32xf32, #tpu.memory_space<vmem>>, %arg9: memref<1x8x32xf32, #tpu.memory_space<vmem>>, %arg10: memref<1x8x32xf32, #tpu.memory_space<vmem>>, %arg11: memref<8x8x128xf32, #tpu.memory_space<vmem>>) attributes {dimension_semantics = [#tpu.dimension_semantics<parallel>, #tpu.dimension_semantics<arbitrary>], iteration_bounds = array<i64: 1, 2>, scalar_prefetch = 0 : i64, scratch_operands = 1 : i64, tpu.core_type = #tpu.core_type<tc>, window_params = [{transform_indices = @transform_0, window_bounds = array<i64: 8, 8, 16>}, {transform_indices = @transform_1, window_bounds = array<i64: 1, 8, 32>}, {transform_indices = @transform_2, window_bounds = array<i64: 1, 8, 32>}, {transform_indices = @transform_3, window_bounds = array<i64: 1, 32, 128>}, {transform_indices = @transform_4, window_bounds = array<i64: 1, 32, 128>}, {transform_indices = @transform_5, window_bounds = array<i64: 1, 1, 128>}, {transform_indices = @transform_6, window_bounds = array<i64: 8, 8, 32>}, {transform_indices = @transform_7, window_bounds = array<i64: 1, 8, 32>}, {transform_indices = @transform_8, window_bounds = array<i64: 1, 8, 32>}]} {
    %c0 = arith.constant 0 : index
    %c0_0 = arith.constant 0 : index
    %c0_1 = arith.constant 0 : index
    %0 = vector.load %arg7[%c0, %c0_0, %c0_1] : memref<1x1x128xf32, #tpu.memory_space<vmem>>, vector<1x1x128xf32>
    %1 = vector.shape_cast %0 : vector<1x1x128xf32> to vector<1x128xf32>
    %c0_i32 = arith.constant 0 : i32
    %2 = arith.cmpi eq, %arg1, %c0_i32 : i32
    %3 = arith.extui %2 : i1 to i32
    %c0_i32_2 = arith.constant 0 : i32
    %4 = arith.cmpi ne, %3, %c0_i32_2 : i32
    scf.if %4 {
      %c0_108 = arith.constant 0 : index
      %c0_109 = arith.constant 0 : index
      %c0_110 = arith.constant 0 : index
      %268 = vector.load %arg2[%c0_108, %c0_109, %c0_110] : memref<8x8x16xf32, #tpu.memory_space<vmem>>, vector<8x8x16xf32>
      %269 = vector.shape_cast %268 : vector<8x8x16xf32> to vector<64x16xf32>
      %c0_111 = arith.constant 0 : index
      %c0_112 = arith.constant 0 : index
      %c0_113 = arith.constant 0 : index
      %270 = vector.load %arg5[%c0_111, %c0_112, %c0_113] : memref<1x32x128xf32, #tpu.memory_space<vmem>>, vector<1x16x128xf32>
      %271 = vector.shape_cast %270 : vector<1x16x128xf32> to vector<16x128xf32>
      %cst_114 = arith.constant dense<0.000000e+00> : vector<64x128xf32>
      %272 = tpu.matmul %269, %271, %cst_114 {dimension_numbers = #tpu.dot_dimension_numbers<[1], [0], [0], [1], [0, 0, 1, 1], [], []>} : vector<64x16xf32>, vector<16x128xf32>, vector<64x128xf32> -> vector<64x128xf32>
      %273 = vector.broadcast %1 : vector<1x128xf32> to vector<64x128xf32>
      %274 = arith.addf %272, %273 : vector<64x128xf32>
      %275 = vector.shape_cast %274 : vector<64x128xf32> to vector<8x8x128xf32>
      %c0_115 = arith.constant 0 : index
      %c0_116 = arith.constant 0 : index
      %c0_117 = arith.constant 0 : index
      %276 = vector.load %arg11[%c0_115, %c0_116, %c0_117] : memref<8x8x128xf32, #tpu.memory_space<vmem>>, vector<8x8x128xf32>
      tpu.vector_store %arg11[%c0_115, %c0_116, %c0_117], %275 {strides = array<i32>} : memref<8x8x128xf32, #tpu.memory_space<vmem>>, vector<8x8x128xf32>,
    } else {
    }
    %c0_i32_3 = arith.constant 0 : i32
    %5 = arith.cmpi sgt, %arg1, %c0_i32_3 : i32
    %6 = arith.extui %5 : i1 to i32
    %c0_i32_4 = arith.constant 0 : i32
    %7 = arith.cmpi ne, %6, %c0_i32_4 : i32
    scf.if %7 {
      %c0_108 = arith.constant 0 : index
      %c0_109 = arith.constant 0 : index
      %c0_110 = arith.constant 0 : index
      %268 = vector.load %arg8[%c0_108, %c0_109, %c0_110] : memref<8x8x32xf32, #tpu.memory_space<vmem>>, vector<8x8x32xf32>
      %269 = vector.shape_cast %268 : vector<8x8x32xf32> to vector<64x32xf32>
      %c0_111 = arith.constant 0 : index
      %c0_112 = arith.constant 0 : index
      %c0_113 = arith.constant 0 : index
      %270 = vector.load %arg5[%c0_111, %c0_112, %c0_113] : memref<1x32x128xf32, #tpu.memory_space<vmem>>, vector<1x32x128xf32>
      %271 = vector.shape_cast %270 : vector<1x32x128xf32> to vector<32x128xf32>
      %cst_114 = arith.constant dense<0.000000e+00> : vector<64x128xf32>
      %272 = tpu.matmul %269, %271, %cst_114 {dimension_numbers = #tpu.dot_dimension_numbers<[1], [0], [0], [1], [0, 0, 1, 1], [], []>} : vector<64x32xf32>, vector<32x128xf32>, vector<64x128xf32> -> vector<64x128xf32>
      %273 = vector.broadcast %1 : vector<1x128xf32> to vector<64x128xf32>
      %274 = arith.addf %272, %273 : vector<64x128xf32>
      %275 = vector.shape_cast %274 : vector<64x128xf32> to vector<8x8x128xf32>
      %c0_115 = arith.constant 0 : index
      %c0_116 = arith.constant 0 : index
      %c0_117 = arith.constant 0 : index
      %276 = vector.load %arg11[%c0_115, %c0_116, %c0_117] : memref<8x8x128xf32, #tpu.memory_space<vmem>>, vector<8x8x128xf32>
      tpu.vector_store %arg11[%c0_115, %c0_116, %c0_117], %275 {strides = array<i32>} : memref<8x8x128xf32, #tpu.memory_space<vmem>>, vector<8x8x128xf32>,
    } else {
    }
    %c0_5 = arith.constant 0 : index
    %c0_6 = arith.constant 0 : index
    %c0_7 = arith.constant 0 : index
    %8 = vector.load %arg6[%c0_5, %c0_6, %c0_7] : memref<1x32x128xf32, #tpu.memory_space<vmem>>, vector<1x32x128xf32>
    %9 = vector.shape_cast %8 : vector<1x32x128xf32> to vector<32x128xf32>
    %c0_8 = arith.constant 0 : index
    %c0_9 = arith.constant 0 : index
    %c0_10 = arith.constant 0 : index
    %10 = vector.load %arg3[%c0_8, %c0_9, %c0_10] : memref<1x8x32xf32, #tpu.memory_space<vmem>>, vector<1x8x32xf32>
    %11 = vector.shape_cast %10 : vector<1x8x32xf32> to vector<8x32xf32>
    %c0_11 = arith.constant 0 : index
    %c0_12 = arith.constant 0 : index
    %c0_13 = arith.constant 0 : index
    %12 = vector.load %arg4[%c0_11, %c0_12, %c0_13] : memref<1x8x32xf32, #tpu.memory_space<vmem>>, vector<1x8x32xf32>
    %13 = vector.shape_cast %12 : vector<1x8x32xf32> to vector<8x32xf32>
    %c0_i32_14 = arith.constant 0 : i32
    %14 = arith.index_cast %c0_i32_14 : i32 to index
    %c0_15 = arith.constant 0 : index
    %c0_16 = arith.constant 0 : index
    %15 = vector.load %arg11[%14, %c0_15, %c0_16] : memref<8x8x128xf32, #tpu.memory_space<vmem>>, vector<1x8x128xf32>
    %16 = vector.shape_cast %15 : vector<1x8x128xf32> to vector<8x128xf32>
    %cst = arith.constant dense<0.000000e+00> : vector<8x128xf32>
    %17 = tpu.matmul %11, %9, %cst {dimension_numbers = #tpu.dot_dimension_numbers<[1], [0], [0], [1], [0, 0, 1, 1], [], []>} : vector<8x32xf32>, vector<32x128xf32>, vector<8x128xf32> -> vector<8x128xf32>
    %18 = arith.addf %16, %17 : vector<8x128xf32>
    %19 = math.tanh %18 : vector<8x128xf32>
    %20 = vector.extract_strided_slice %19 {offsets = [0, 0], sizes = [8, 32], strides = [1, 1]} : vector<8x128xf32> to vector<8x32xf32>
    %cst_17 = arith.constant 5.000000e-01 : f32
    %21 = vector.broadcast %cst_17 : f32 to vector<8x32xf32>
    %22 = arith.mulf %20, %21 : vector<8x32xf32>
    %cst_18 = arith.constant 5.000000e-01 : f32
    %23 = vector.broadcast %cst_18 : f32 to vector<8x32xf32>
    %24 = arith.addf %22, %23 : vector<8x32xf32>
    %25 = vector.extract_strided_slice %19 {offsets = [0, 32], sizes = [8, 32], strides = [1, 1]} : vector<8x128xf32> to vector<8x32xf32>
    %cst_19 = arith.constant 5.000000e-01 : f32
    %26 = vector.broadcast %cst_19 : f32 to vector<8x32xf32>
    %27 = arith.mulf %25, %26 : vector<8x32xf32>
    %cst_20 = arith.constant 5.000000e-01 : f32
    %28 = vector.broadcast %cst_20 : f32 to vector<8x32xf32>
    %29 = arith.addf %27, %28 : vector<8x32xf32>
    %30 = vector.extract_strided_slice %19 {offsets = [0, 64], sizes = [8, 32], strides = [1, 1]} : vector<8x128xf32> to vector<8x32xf32>
    %31 = vector.extract_strided_slice %19 {offsets = [0, 96], sizes = [8, 32], strides = [1, 1]} : vector<8x128xf32> to vector<8x32xf32>
    %cst_21 = arith.constant 5.000000e-01 : f32
    %32 = vector.broadcast %cst_21 : f32 to vector<8x32xf32>
    %33 = arith.mulf %31, %32 : vector<8x32xf32>
    %cst_22 = arith.constant 5.000000e-01 : f32
    %34 = vector.broadcast %cst_22 : f32 to vector<8x32xf32>
    %35 = arith.addf %33, %34 : vector<8x32xf32>
    %36 = arith.mulf %29, %13 : vector<8x32xf32>
    %37 = arith.mulf %24, %30 : vector<8x32xf32>
    %38 = arith.addf %36, %37 : vector<8x32xf32>
    %39 = math.tanh %38 : vector<8x32xf32>
    %40 = arith.mulf %35, %39 : vector<8x32xf32>
    %41 = arith.index_cast %c0_i32_14 : i32 to index
    %c0_23 = arith.constant 0 : index
    %c0_24 = arith.constant 0 : index
    %42 = vector.load %arg8[%41, %c0_23, %c0_24] : memref<8x8x32xf32, #tpu.memory_space<vmem>>, vector<1x8x32xf32>
    %43 = vector.shape_cast %42 : vector<1x8x32xf32> to vector<8x32xf32>
    %44 = vector.shape_cast %40 : vector<8x32xf32> to vector<1x8x32xf32>
    tpu.vector_store %arg8[%41, %c0_23, %c0_24], %44 {strides = array<i32>} : memref<8x8x32xf32, #tpu.memory_space<vmem>>, vector<1x8x32xf32>,
    %c1_i32 = arith.constant 1 : i32
    %45 = arith.index_cast %c1_i32 : i32 to index
    %c0_25 = arith.constant 0 : index
    %c0_26 = arith.constant 0 : index
    %46 = vector.load %arg11[%45, %c0_25, %c0_26] : memref<8x8x128xf32, #tpu.memory_space<vmem>>, vector<1x8x128xf32>
    %47 = vector.shape_cast %46 : vector<1x8x128xf32> to vector<8x128xf32>
    %cst_27 = arith.constant dense<0.000000e+00> : vector<8x128xf32>
    %48 = tpu.matmul %40, %9, %cst_27 {dimension_numbers = #tpu.dot_dimension_numbers<[1], [0], [0], [1], [0, 0, 1, 1], [], []>} : vector<8x32xf32>, vector<32x128xf32>, vector<8x128xf32> -> vector<8x128xf32>
    %49 = arith.addf %47, %48 : vector<8x128xf32>
    %50 = math.tanh %49 : vector<8x128xf32>
    %51 = vector.extract_strided_slice %50 {offsets = [0, 0], sizes = [8, 32], strides = [1, 1]} : vector<8x128xf32> to vector<8x32xf32>
    %cst_28 = arith.constant 5.000000e-01 : f32
    %52 = vector.broadcast %cst_28 : f32 to vector<8x32xf32>
    %53 = arith.mulf %51, %52 : vector<8x32xf32>
    %cst_29 = arith.constant 5.000000e-01 : f32
    %54 = vector.broadcast %cst_29 : f32 to vector<8x32xf32>
    %55 = arith.addf %53, %54 : vector<8x32xf32>
    %56 = vector.extract_strided_slice %50 {offsets = [0, 32], sizes = [8, 32], strides = [1, 1]} : vector<8x128xf32> to vector<8x32xf32>
    %cst_30 = arith.constant 5.000000e-01 : f32
    %57 = vector.broadcast %cst_30 : f32 to vector<8x32xf32>
    %58 = arith.mulf %56, %57 : vector<8x32xf32>
    %cst_31 = arith.constant 5.000000e-01 : f32
    %59 = vector.broadcast %cst_31 : f32 to vector<8x32xf32>
    %60 = arith.addf %58, %59 : vector<8x32xf32>
    %61 = vector.extract_strided_slice %50 {offsets = [0, 64], sizes = [8, 32], strides = [1, 1]} : vector<8x128xf32> to vector<8x32xf32>
    %62 = vector.extract_strided_slice %50 {offsets = [0, 96], sizes = [8, 32], strides = [1, 1]} : vector<8x128xf32> to vector<8x32xf32>
    %cst_32 = arith.constant 5.000000e-01 : f32
    %63 = vector.broadcast %cst_32 : f32 to vector<8x32xf32>
    %64 = arith.mulf %62, %63 : vector<8x32xf32>
    %cst_33 = arith.constant 5.000000e-01 : f32
    %65 = vector.broadcast %cst_33 : f32 to vector<8x32xf32>
    %66 = arith.addf %64, %65 : vector<8x32xf32>
    %67 = arith.mulf %60, %38 : vector<8x32xf32>
    %68 = arith.mulf %55, %61 : vector<8x32xf32>
    %69 = arith.addf %67, %68 : vector<8x32xf32>
    %70 = math.tanh %69 : vector<8x32xf32>
    %71 = arith.mulf %66, %70 : vector<8x32xf32>
    %72 = arith.index_cast %c1_i32 : i32 to index
    %c0_34 = arith.constant 0 : index
    %c0_35 = arith.constant 0 : index
    %73 = vector.load %arg8[%72, %c0_34, %c0_35] : memref<8x8x32xf32, #tpu.memory_space<vmem>>, vector<1x8x32xf32>
    %74 = vector.shape_cast %73 : vector<1x8x32xf32> to vector<8x32xf32>
    %75 = vector.shape_cast %71 : vector<8x32xf32> to vector<1x8x32xf32>
    tpu.vector_store %arg8[%72, %c0_34, %c0_35], %75 {strides = array<i32>} : memref<8x8x32xf32, #tpu.memory_space<vmem>>, vector<1x8x32xf32>,
    %c2_i32 = arith.constant 2 : i32
    %76 = arith.index_cast %c2_i32 : i32 to index
    %c0_36 = arith.constant 0 : index
    %c0_37 = arith.constant 0 : index
    %77 = vector.load %arg11[%76, %c0_36, %c0_37] : memref<8x8x128xf32, #tpu.memory_space<vmem>>, vector<1x8x128xf32>
    %78 = vector.shape_cast %77 : vector<1x8x128xf32> to vector<8x128xf32>
    %cst_38 = arith.constant dense<0.000000e+00> : vector<8x128xf32>
    %79 = tpu.matmul %71, %9, %cst_38 {dimension_numbers = #tpu.dot_dimension_numbers<[1], [0], [0], [1], [0, 0, 1, 1], [], []>} : vector<8x32xf32>, vector<32x128xf32>, vector<8x128xf32> -> vector<8x128xf32>
    %80 = arith.addf %78, %79 : vector<8x128xf32>
    %81 = math.tanh %80 : vector<8x128xf32>
    %82 = vector.extract_strided_slice %81 {offsets = [0, 0], sizes = [8, 32], strides = [1, 1]} : vector<8x128xf32> to vector<8x32xf32>
    %cst_39 = arith.constant 5.000000e-01 : f32
    %83 = vector.broadcast %cst_39 : f32 to vector<8x32xf32>
    %84 = arith.mulf %82, %83 : vector<8x32xf32>
    %cst_40 = arith.constant 5.000000e-01 : f32
    %85 = vector.broadcast %cst_40 : f32 to vector<8x32xf32>
    %86 = arith.addf %84, %85 : vector<8x32xf32>
    %87 = vector.extract_strided_slice %81 {offsets = [0, 32], sizes = [8, 32], strides = [1, 1]} : vector<8x128xf32> to vector<8x32xf32>
    %cst_41 = arith.constant 5.000000e-01 : f32
    %88 = vector.broadcast %cst_41 : f32 to vector<8x32xf32>
    %89 = arith.mulf %87, %88 : vector<8x32xf32>
    %cst_42 = arith.constant 5.000000e-01 : f32
    %90 = vector.broadcast %cst_42 : f32 to vector<8x32xf32>
    %91 = arith.addf %89, %90 : vector<8x32xf32>
    %92 = vector.extract_strided_slice %81 {offsets = [0, 64], sizes = [8, 32], strides = [1, 1]} : vector<8x128xf32> to vector<8x32xf32>
    %93 = vector.extract_strided_slice %81 {offsets = [0, 96], sizes = [8, 32], strides = [1, 1]} : vector<8x128xf32> to vector<8x32xf32>
    %cst_43 = arith.constant 5.000000e-01 : f32
    %94 = vector.broadcast %cst_43 : f32 to vector<8x32xf32>
    %95 = arith.mulf %93, %94 : vector<8x32xf32>
    %cst_44 = arith.constant 5.000000e-01 : f32
    %96 = vector.broadcast %cst_44 : f32 to vector<8x32xf32>
    %97 = arith.addf %95, %96 : vector<8x32xf32>
    %98 = arith.mulf %91, %69 : vector<8x32xf32>
    %99 = arith.mulf %86, %92 : vector<8x32xf32>
    %100 = arith.addf %98, %99 : vector<8x32xf32>
    %101 = math.tanh %100 : vector<8x32xf32>
    %102 = arith.mulf %97, %101 : vector<8x32xf32>
    %103 = arith.index_cast %c2_i32 : i32 to index
    %c0_45 = arith.constant 0 : index
    %c0_46 = arith.constant 0 : index
    %104 = vector.load %arg8[%103, %c0_45, %c0_46] : memref<8x8x32xf32, #tpu.memory_space<vmem>>, vector<1x8x32xf32>
    %105 = vector.shape_cast %104 : vector<1x8x32xf32> to vector<8x32xf32>
    %106 = vector.shape_cast %102 : vector<8x32xf32> to vector<1x8x32xf32>
    tpu.vector_store %arg8[%103, %c0_45, %c0_46], %106 {strides = array<i32>} : memref<8x8x32xf32, #tpu.memory_space<vmem>>, vector<1x8x32xf32>,
    %c3_i32 = arith.constant 3 : i32
    %107 = arith.index_cast %c3_i32 : i32 to index
    %c0_47 = arith.constant 0 : index
    %c0_48 = arith.constant 0 : index
    %108 = vector.load %arg11[%107, %c0_47, %c0_48] : memref<8x8x128xf32, #tpu.memory_space<vmem>>, vector<1x8x128xf32>
    %109 = vector.shape_cast %108 : vector<1x8x128xf32> to vector<8x128xf32>
    %cst_49 = arith.constant dense<0.000000e+00> : vector<8x128xf32>
    %110 = tpu.matmul %102, %9, %cst_49 {dimension_numbers = #tpu.dot_dimension_numbers<[1], [0], [0], [1], [0, 0, 1, 1], [], []>} : vector<8x32xf32>, vector<32x128xf32>, vector<8x128xf32> -> vector<8x128xf32>
    %111 = arith.addf %109, %110 : vector<8x128xf32>
    %112 = math.tanh %111 : vector<8x128xf32>
    %113 = vector.extract_strided_slice %112 {offsets = [0, 0], sizes = [8, 32], strides = [1, 1]} : vector<8x128xf32> to vector<8x32xf32>
    %cst_50 = arith.constant 5.000000e-01 : f32
    %114 = vector.broadcast %cst_50 : f32 to vector<8x32xf32>
    %115 = arith.mulf %113, %114 : vector<8x32xf32>
    %cst_51 = arith.constant 5.000000e-01 : f32
    %116 = vector.broadcast %cst_51 : f32 to vector<8x32xf32>
    %117 = arith.addf %115, %116 : vector<8x32xf32>
    %118 = vector.extract_strided_slice %112 {offsets = [0, 32], sizes = [8, 32], strides = [1, 1]} : vector<8x128xf32> to vector<8x32xf32>
    %cst_52 = arith.constant 5.000000e-01 : f32
    %119 = vector.broadcast %cst_52 : f32 to vector<8x32xf32>
    %120 = arith.mulf %118, %119 : vector<8x32xf32>
    %cst_53 = arith.constant 5.000000e-01 : f32
    %121 = vector.broadcast %cst_53 : f32 to vector<8x32xf32>
    %122 = arith.addf %120, %121 : vector<8x32xf32>
    %123 = vector.extract_strided_slice %112 {offsets = [0, 64], sizes = [8, 32], strides = [1, 1]} : vector<8x128xf32> to vector<8x32xf32>
    %124 = vector.extract_strided_slice %112 {offsets = [0, 96], sizes = [8, 32], strides = [1, 1]} : vector<8x128xf32> to vector<8x32xf32>
    %cst_54 = arith.constant 5.000000e-01 : f32
    %125 = vector.broadcast %cst_54 : f32 to vector<8x32xf32>
    %126 = arith.mulf %124, %125 : vector<8x32xf32>
    %cst_55 = arith.constant 5.000000e-01 : f32
    %127 = vector.broadcast %cst_55 : f32 to vector<8x32xf32>
    %128 = arith.addf %126, %127 : vector<8x32xf32>
    %129 = arith.mulf %122, %100 : vector<8x32xf32>
    %130 = arith.mulf %117, %123 : vector<8x32xf32>
    %131 = arith.addf %129, %130 : vector<8x32xf32>
    %132 = math.tanh %131 : vector<8x32xf32>
    %133 = arith.mulf %128, %132 : vector<8x32xf32>
    %134 = arith.index_cast %c3_i32 : i32 to index
    %c0_56 = arith.constant 0 : index
    %c0_57 = arith.constant 0 : index
    %135 = vector.load %arg8[%134, %c0_56, %c0_57] : memref<8x8x32xf32, #tpu.memory_space<vmem>>, vector<1x8x32xf32>
    %136 = vector.shape_cast %135 : vector<1x8x32xf32> to vector<8x32xf32>
    %137 = vector.shape_cast %133 : vector<8x32xf32> to vector<1x8x32xf32>
    tpu.vector_store %arg8[%134, %c0_56, %c0_57], %137 {strides = array<i32>} : memref<8x8x32xf32, #tpu.memory_space<vmem>>, vector<1x8x32xf32>,
    %c4_i32 = arith.constant 4 : i32
    %138 = arith.index_cast %c4_i32 : i32 to index
    %c0_58 = arith.constant 0 : index
    %c0_59 = arith.constant 0 : index
    %139 = vector.load %arg11[%138, %c0_58, %c0_59] : memref<8x8x128xf32, #tpu.memory_space<vmem>>, vector<1x8x128xf32>
    %140 = vector.shape_cast %139 : vector<1x8x128xf32> to vector<8x128xf32>
    %cst_60 = arith.constant dense<0.000000e+00> : vector<8x128xf32>
    %141 = tpu.matmul %133, %9, %cst_60 {dimension_numbers = #tpu.dot_dimension_numbers<[1], [0], [0], [1], [0, 0, 1, 1], [], []>} : vector<8x32xf32>, vector<32x128xf32>, vector<8x128xf32> -> vector<8x128xf32>
    %142 = arith.addf %140, %141 : vector<8x128xf32>
    %143 = math.tanh %142 : vector<8x128xf32>
    %144 = vector.extract_strided_slice %143 {offsets = [0, 0], sizes = [8, 32], strides = [1, 1]} : vector<8x128xf32> to vector<8x32xf32>
    %cst_61 = arith.constant 5.000000e-01 : f32
    %145 = vector.broadcast %cst_61 : f32 to vector<8x32xf32>
    %146 = arith.mulf %144, %145 : vector<8x32xf32>
    %cst_62 = arith.constant 5.000000e-01 : f32
    %147 = vector.broadcast %cst_62 : f32 to vector<8x32xf32>
    %148 = arith.addf %146, %147 : vector<8x32xf32>
    %149 = vector.extract_strided_slice %143 {offsets = [0, 32], sizes = [8, 32], strides = [1, 1]} : vector<8x128xf32> to vector<8x32xf32>
    %cst_63 = arith.constant 5.000000e-01 : f32
    %150 = vector.broadcast %cst_63 : f32 to vector<8x32xf32>
    %151 = arith.mulf %149, %150 : vector<8x32xf32>
    %cst_64 = arith.constant 5.000000e-01 : f32
    %152 = vector.broadcast %cst_64 : f32 to vector<8x32xf32>
    %153 = arith.addf %151, %152 : vector<8x32xf32>
    %154 = vector.extract_strided_slice %143 {offsets = [0, 64], sizes = [8, 32], strides = [1, 1]} : vector<8x128xf32> to vector<8x32xf32>
    %155 = vector.extract_strided_slice %143 {offsets = [0, 96], sizes = [8, 32], strides = [1, 1]} : vector<8x128xf32> to vector<8x32xf32>
    %cst_65 = arith.constant 5.000000e-01 : f32
    %156 = vector.broadcast %cst_65 : f32 to vector<8x32xf32>
    %157 = arith.mulf %155, %156 : vector<8x32xf32>
    %cst_66 = arith.constant 5.000000e-01 : f32
    %158 = vector.broadcast %cst_66 : f32 to vector<8x32xf32>
    %159 = arith.addf %157, %158 : vector<8x32xf32>
    %160 = arith.mulf %153, %131 : vector<8x32xf32>
    %161 = arith.mulf %148, %154 : vector<8x32xf32>
    %162 = arith.addf %160, %161 : vector<8x32xf32>
    %163 = math.tanh %162 : vector<8x32xf32>
    %164 = arith.mulf %159, %163 : vector<8x32xf32>
    %165 = arith.index_cast %c4_i32 : i32 to index
    %c0_67 = arith.constant 0 : index
    %c0_68 = arith.constant 0 : index
    %166 = vector.load %arg8[%165, %c0_67, %c0_68] : memref<8x8x32xf32, #tpu.memory_space<vmem>>, vector<1x8x32xf32>
    %167 = vector.shape_cast %166 : vector<1x8x32xf32> to vector<8x32xf32>
    %168 = vector.shape_cast %164 : vector<8x32xf32> to vector<1x8x32xf32>
    tpu.vector_store %arg8[%165, %c0_67, %c0_68], %168 {strides = array<i32>} : memref<8x8x32xf32, #tpu.memory_space<vmem>>, vector<1x8x32xf32>,
    %c5_i32 = arith.constant 5 : i32
    %169 = arith.index_cast %c5_i32 : i32 to index
    %c0_69 = arith.constant 0 : index
    %c0_70 = arith.constant 0 : index
    %170 = vector.load %arg11[%169, %c0_69, %c0_70] : memref<8x8x128xf32, #tpu.memory_space<vmem>>, vector<1x8x128xf32>
    %171 = vector.shape_cast %170 : vector<1x8x128xf32> to vector<8x128xf32>
    %cst_71 = arith.constant dense<0.000000e+00> : vector<8x128xf32>
    %172 = tpu.matmul %164, %9, %cst_71 {dimension_numbers = #tpu.dot_dimension_numbers<[1], [0], [0], [1], [0, 0, 1, 1], [], []>} : vector<8x32xf32>, vector<32x128xf32>, vector<8x128xf32> -> vector<8x128xf32>
    %173 = arith.addf %171, %172 : vector<8x128xf32>
    %174 = math.tanh %173 : vector<8x128xf32>
    %175 = vector.extract_strided_slice %174 {offsets = [0, 0], sizes = [8, 32], strides = [1, 1]} : vector<8x128xf32> to vector<8x32xf32>
    %cst_72 = arith.constant 5.000000e-01 : f32
    %176 = vector.broadcast %cst_72 : f32 to vector<8x32xf32>
    %177 = arith.mulf %175, %176 : vector<8x32xf32>
    %cst_73 = arith.constant 5.000000e-01 : f32
    %178 = vector.broadcast %cst_73 : f32 to vector<8x32xf32>
    %179 = arith.addf %177, %178 : vector<8x32xf32>
    %180 = vector.extract_strided_slice %174 {offsets = [0, 32], sizes = [8, 32], strides = [1, 1]} : vector<8x128xf32> to vector<8x32xf32>
    %cst_74 = arith.constant 5.000000e-01 : f32
    %181 = vector.broadcast %cst_74 : f32 to vector<8x32xf32>
    %182 = arith.mulf %180, %181 : vector<8x32xf32>
    %cst_75 = arith.constant 5.000000e-01 : f32
    %183 = vector.broadcast %cst_75 : f32 to vector<8x32xf32>
    %184 = arith.addf %182, %183 : vector<8x32xf32>
    %185 = vector.extract_strided_slice %174 {offsets = [0, 64], sizes = [8, 32], strides = [1, 1]} : vector<8x128xf32> to vector<8x32xf32>
    %186 = vector.extract_strided_slice %174 {offsets = [0, 96], sizes = [8, 32], strides = [1, 1]} : vector<8x128xf32> to vector<8x32xf32>
    %cst_76 = arith.constant 5.000000e-01 : f32
    %187 = vector.broadcast %cst_76 : f32 to vector<8x32xf32>
    %188 = arith.mulf %186, %187 : vector<8x32xf32>
    %cst_77 = arith.constant 5.000000e-01 : f32
    %189 = vector.broadcast %cst_77 : f32 to vector<8x32xf32>
    %190 = arith.addf %188, %189 : vector<8x32xf32>
    %191 = arith.mulf %184, %162 : vector<8x32xf32>
    %192 = arith.mulf %179, %185 : vector<8x32xf32>
    %193 = arith.addf %191, %192 : vector<8x32xf32>
    %194 = math.tanh %193 : vector<8x32xf32>
    %195 = arith.mulf %190, %194 : vector<8x32xf32>
    %196 = arith.index_cast %c5_i32 : i32 to index
    %c0_78 = arith.constant 0 : index
    %c0_79 = arith.constant 0 : index
    %197 = vector.load %arg8[%196, %c0_78, %c0_79] : memref<8x8x32xf32, #tpu.memory_space<vmem>>, vector<1x8x32xf32>
    %198 = vector.shape_cast %197 : vector<1x8x32xf32> to vector<8x32xf32>
    %199 = vector.shape_cast %195 : vector<8x32xf32> to vector<1x8x32xf32>
    tpu.vector_store %arg8[%196, %c0_78, %c0_79], %199 {strides = array<i32>} : memref<8x8x32xf32, #tpu.memory_space<vmem>>, vector<1x8x32xf32>,
    %c6_i32 = arith.constant 6 : i32
    %200 = arith.index_cast %c6_i32 : i32 to index
    %c0_80 = arith.constant 0 : index
    %c0_81 = arith.constant 0 : index
    %201 = vector.load %arg11[%200, %c0_80, %c0_81] : memref<8x8x128xf32, #tpu.memory_space<vmem>>, vector<1x8x128xf32>
    %202 = vector.shape_cast %201 : vector<1x8x128xf32> to vector<8x128xf32>
    %cst_82 = arith.constant dense<0.000000e+00> : vector<8x128xf32>
    %203 = tpu.matmul %195, %9, %cst_82 {dimension_numbers = #tpu.dot_dimension_numbers<[1], [0], [0], [1], [0, 0, 1, 1], [], []>} : vector<8x32xf32>, vector<32x128xf32>, vector<8x128xf32> -> vector<8x128xf32>
    %204 = arith.addf %202, %203 : vector<8x128xf32>
    %205 = math.tanh %204 : vector<8x128xf32>
    %206 = vector.extract_strided_slice %205 {offsets = [0, 0], sizes = [8, 32], strides = [1, 1]} : vector<8x128xf32> to vector<8x32xf32>
    %cst_83 = arith.constant 5.000000e-01 : f32
    %207 = vector.broadcast %cst_83 : f32 to vector<8x32xf32>
    %208 = arith.mulf %206, %207 : vector<8x32xf32>
    %cst_84 = arith.constant 5.000000e-01 : f32
    %209 = vector.broadcast %cst_84 : f32 to vector<8x32xf32>
    %210 = arith.addf %208, %209 : vector<8x32xf32>
    %211 = vector.extract_strided_slice %205 {offsets = [0, 32], sizes = [8, 32], strides = [1, 1]} : vector<8x128xf32> to vector<8x32xf32>
    %cst_85 = arith.constant 5.000000e-01 : f32
    %212 = vector.broadcast %cst_85 : f32 to vector<8x32xf32>
    %213 = arith.mulf %211, %212 : vector<8x32xf32>
    %cst_86 = arith.constant 5.000000e-01 : f32
    %214 = vector.broadcast %cst_86 : f32 to vector<8x32xf32>
    %215 = arith.addf %213, %214 : vector<8x32xf32>
    %216 = vector.extract_strided_slice %205 {offsets = [0, 64], sizes = [8, 32], strides = [1, 1]} : vector<8x128xf32> to vector<8x32xf32>
    %217 = vector.extract_strided_slice %205 {offsets = [0, 96], sizes = [8, 32], strides = [1, 1]} : vector<8x128xf32> to vector<8x32xf32>
    %cst_87 = arith.constant 5.000000e-01 : f32
    %218 = vector.broadcast %cst_87 : f32 to vector<8x32xf32>
    %219 = arith.mulf %217, %218 : vector<8x32xf32>
    %cst_88 = arith.constant 5.000000e-01 : f32
    %220 = vector.broadcast %cst_88 : f32 to vector<8x32xf32>
    %221 = arith.addf %219, %220 : vector<8x32xf32>
    %222 = arith.mulf %215, %193 : vector<8x32xf32>
    %223 = arith.mulf %210, %216 : vector<8x32xf32>
    %224 = arith.addf %222, %223 : vector<8x32xf32>
    %225 = math.tanh %224 : vector<8x32xf32>
    %226 = arith.mulf %221, %225 : vector<8x32xf32>
    %227 = arith.index_cast %c6_i32 : i32 to index
    %c0_89 = arith.constant 0 : index
    %c0_90 = arith.constant 0 : index
    %228 = vector.load %arg8[%227, %c0_89, %c0_90] : memref<8x8x32xf32, #tpu.memory_space<vmem>>, vector<1x8x32xf32>
    %229 = vector.shape_cast %228 : vector<1x8x32xf32> to vector<8x32xf32>
    %230 = vector.shape_cast %226 : vector<8x32xf32> to vector<1x8x32xf32>
    tpu.vector_store %arg8[%227, %c0_89, %c0_90], %230 {strides = array<i32>} : memref<8x8x32xf32, #tpu.memory_space<vmem>>, vector<1x8x32xf32>,
    %c7_i32 = arith.constant 7 : i32
    %231 = arith.index_cast %c7_i32 : i32 to index
    %c0_91 = arith.constant 0 : index
    %c0_92 = arith.constant 0 : index
    %232 = vector.load %arg11[%231, %c0_91, %c0_92] : memref<8x8x128xf32, #tpu.memory_space<vmem>>, vector<1x8x128xf32>
    %233 = vector.shape_cast %232 : vector<1x8x128xf32> to vector<8x128xf32>
    %cst_93 = arith.constant dense<0.000000e+00> : vector<8x128xf32>
    %234 = tpu.matmul %226, %9, %cst_93 {dimension_numbers = #tpu.dot_dimension_numbers<[1], [0], [0], [1], [0, 0, 1, 1], [], []>} : vector<8x32xf32>, vector<32x128xf32>, vector<8x128xf32> -> vector<8x128xf32>
    %235 = arith.addf %233, %234 : vector<8x128xf32>
    %236 = math.tanh %235 : vector<8x128xf32>
    %237 = vector.extract_strided_slice %236 {offsets = [0, 0], sizes = [8, 32], strides = [1, 1]} : vector<8x128xf32> to vector<8x32xf32>
    %cst_94 = arith.constant 5.000000e-01 : f32
    %238 = vector.broadcast %cst_94 : f32 to vector<8x32xf32>
    %239 = arith.mulf %237, %238 : vector<8x32xf32>
    %cst_95 = arith.constant 5.000000e-01 : f32
    %240 = vector.broadcast %cst_95 : f32 to vector<8x32xf32>
    %241 = arith.addf %239, %240 : vector<8x32xf32>
    %242 = vector.extract_strided_slice %236 {offsets = [0, 32], sizes = [8, 32], strides = [1, 1]} : vector<8x128xf32> to vector<8x32xf32>
    %cst_96 = arith.constant 5.000000e-01 : f32
    %243 = vector.broadcast %cst_96 : f32 to vector<8x32xf32>
    %244 = arith.mulf %242, %243 : vector<8x32xf32>
    %cst_97 = arith.constant 5.000000e-01 : f32
    %245 = vector.broadcast %cst_97 : f32 to vector<8x32xf32>
    %246 = arith.addf %244, %245 : vector<8x32xf32>
    %247 = vector.extract_strided_slice %236 {offsets = [0, 64], sizes = [8, 32], strides = [1, 1]} : vector<8x128xf32> to vector<8x32xf32>
    %248 = vector.extract_strided_slice %236 {offsets = [0, 96], sizes = [8, 32], strides = [1, 1]} : vector<8x128xf32> to vector<8x32xf32>
    %cst_98 = arith.constant 5.000000e-01 : f32
    %249 = vector.broadcast %cst_98 : f32 to vector<8x32xf32>
    %250 = arith.mulf %248, %249 : vector<8x32xf32>
    %cst_99 = arith.constant 5.000000e-01 : f32
    %251 = vector.broadcast %cst_99 : f32 to vector<8x32xf32>
    %252 = arith.addf %250, %251 : vector<8x32xf32>
    %253 = arith.mulf %246, %224 : vector<8x32xf32>
    %254 = arith.mulf %241, %247 : vector<8x32xf32>
    %255 = arith.addf %253, %254 : vector<8x32xf32>
    %256 = math.tanh %255 : vector<8x32xf32>
    %257 = arith.mulf %252, %256 : vector<8x32xf32>
    %258 = arith.index_cast %c7_i32 : i32 to index
    %c0_100 = arith.constant 0 : index
    %c0_101 = arith.constant 0 : index
    %259 = vector.load %arg8[%258, %c0_100, %c0_101] : memref<8x8x32xf32, #tpu.memory_space<vmem>>, vector<1x8x32xf32>
    %260 = vector.shape_cast %259 : vector<1x8x32xf32> to vector<8x32xf32>
    %261 = vector.shape_cast %257 : vector<8x32xf32> to vector<1x8x32xf32>
    tpu.vector_store %arg8[%258, %c0_100, %c0_101], %261 {strides = array<i32>} : memref<8x8x32xf32, #tpu.memory_space<vmem>>, vector<1x8x32xf32>,
    %c8_i32 = arith.constant 8 : i32
    %c0_102 = arith.constant 0 : index
    %c0_103 = arith.constant 0 : index
    %c0_104 = arith.constant 0 : index
    %262 = vector.load %arg9[%c0_102, %c0_103, %c0_104] : memref<1x8x32xf32, #tpu.memory_space<vmem>>, vector<1x8x32xf32>
    %263 = vector.shape_cast %262 : vector<1x8x32xf32> to vector<8x32xf32>
    %264 = vector.shape_cast %257 : vector<8x32xf32> to vector<1x8x32xf32>
    tpu.vector_store %arg9[%c0_102, %c0_103, %c0_104], %264 {strides = array<i32>} : memref<1x8x32xf32, #tpu.memory_space<vmem>>, vector<1x8x32xf32>,
    %c0_105 = arith.constant 0 : index
    %c0_106 = arith.constant 0 : index
    %c0_107 = arith.constant 0 : index
    %265 = vector.load %arg10[%c0_105, %c0_106, %c0_107] : memref<1x8x32xf32, #tpu.memory_space<vmem>>, vector<1x8x32xf32>
    %266 = vector.shape_cast %265 : vector<1x8x32xf32> to vector<8x32xf32>
    %267 = vector.shape_cast %255 : vector<8x32xf32> to vector<1x8x32xf32>
    tpu.vector_store %arg10[%c0_105, %c0_106, %c0_107], %267 {strides = array<i32>} : memref<1x8x32xf32, #tpu.memory_space<vmem>>, vector<1x8x32xf32>,
    return
  }
  func.func @transform_0(%arg0: i32, %arg1: i32) -> (i32, i32, i32) {
    %c0_i32 = arith.constant 0 : i32
    %c0_i32_0 = arith.constant 0 : i32
    %c0_i32_1 = arith.constant 0 : i32
    return %c0_i32, %arg0, %c0_i32_0 : i32, i32, i32
  }
  func.func @transform_1(%arg0: i32, %arg1: i32) -> (i32, i32, i32) {
    %c0_i32 = arith.constant 0 : i32
    %c0_i32_0 = arith.constant 0 : i32
    return %arg1, %arg0, %c0_i32 : i32, i32, i32
  }
  func.func @transform_2(%arg0: i32, %arg1: i32) -> (i32, i32, i32) {
    %c0_i32 = arith.constant 0 : i32
    %c0_i32_0 = arith.constant 0 : i32
    return %arg1, %arg0, %c0_i32 : i32, i32, i32
  }
  func.func @transform_3(%arg0: i32, %arg1: i32) -> (i32, i32, i32) {
    %c0_i32 = arith.constant 0 : i32
    %c0_i32_0 = arith.constant 0 : i32
    %c0_i32_1 = arith.constant 0 : i32
    return %arg1, %c0_i32, %c0_i32_0 : i32, i32, i32
  }
  func.func @transform_4(%arg0: i32, %arg1: i32) -> (i32, i32, i32) {
    %c0_i32 = arith.constant 0 : i32
    %c0_i32_0 = arith.constant 0 : i32
    %c0_i32_1 = arith.constant 0 : i32
    return %arg1, %c0_i32, %c0_i32_0 : i32, i32, i32
  }
  func.func @transform_5(%arg0: i32, %arg1: i32) -> (i32, i32, i32) {
    %c0_i32 = arith.constant 0 : i32
    %c0_i32_0 = arith.constant 0 : i32
    %c0_i32_1 = arith.constant 0 : i32
    return %arg1, %c0_i32, %c0_i32_0 : i32, i32, i32
  }
  func.func @transform_6(%arg0: i32, %arg1: i32) -> (i32, i32, i32) {
    %c0_i32 = arith.constant 0 : i32
    %c0_i32_0 = arith.constant 0 : i32
    %c0_i32_1 = arith.constant 0 : i32
    return %c0_i32, %arg0, %c0_i32_0 : i32, i32, i32
  }
  func.func @transform_7(%arg0: i32, %arg1: i32) -> (i32, i32, i32) {
    %c0_i32 = arith.constant 0 : i32
    %c0_i32_0 = arith.constant 0 : i32
    return %arg1, %arg0, %c0_i32 : i32, i32, i32
  }
  func.func @transform_8(%arg0: i32, %arg1: i32) -> (i32, i32, i32) {
    %c0_i32 = arith.constant 0 : i32
    %c0_i32_0 = arith.constant 0 : i32
    return %arg1, %arg0, %c0_i32 : i32, i32, i32
  }
}

</mosaic_0001>

<bundles_post_ra>
// kernel: tpu_custom_call.1
= control target key start
LH: loop header
LB: loop body
LE: loop exit
PB: predicated region body
PF: predicated region fallthrough
CT: control target
= control target key end

     0   :  { %s3385_s0 = inlined_call_operand.hbm [shape: f32[8,8,16], index: 0, kind: input, shape index: {}]   ;;  %s3386_s1 = inlined_call_operand.hbm [shape: f32[2,8,32], index: 1, kind: input, shape index: {}]   ;;  %s3387_s2 = inlined_call_operand.hbm [shape: f32[2,8,32], index: 2, kind: input, shape index: {}]   ;;  %s3388_s3 = inlined_call_operand.hbm [shape: f32[2,32,128], index: 3, kind: input, shape index: {}]   ;;  %s3389_s4 = inlined_call_operand.hbm [shape: f32[2,32,128], index: 4, kind: input, shape index: {}]   ;;  %s3390_s5 = inlined_call_operand.hbm [shape: f32[2,1,128], index: 5, kind: input, shape index: {}]   ;;  %s3391_s6 = inlined_call_operand.hbm [shape: f32[8,8,32], index: 6, kind: output, shape index: {0}]   ;;  %s3392_s7 = inlined_call_operand.hbm [shape: f32[2,8,32], index: 7, kind: output, shape index: {1}]   ;;  %s3393_s8 = inlined_call_operand.hbm [shape: f32[2,8,32], index: 8, kind: output, shape index: {2}]  }
   0x1   :  { %3422 = sst [smem:[#allocation29_spill]] %s3386_s1 }
   0x2   :  { %3423 = sst [smem:[#allocation30_spill]] %s3388_s3 }
   0x3   :  { %3424 = sst [smem:[#allocation31_spill]] %s3391_s6 }
   0x4   :  { %3425 = sst [smem:[#allocation32_spill]] %s3393_s8 }
   0x5   :  { %14 = vsyncpa [#allocation4], 0 }
   0x6   :  { %15 = vsyncpa [#allocation7], 0 }
   0x7   :  { %17 = vsyncpa [#allocation7 + $0x1], 0 }
   0x8   :  { %18 = vsyncpa [#allocation10], 0 }
   0x9   :  { %20 = vsyncpa [#allocation10 + $0x1], 0 }
   0xa   :  { %21 = vsyncpa [#allocation13], 0 }
   0xb   :  { %23 = vsyncpa [#allocation13 + $0x1], 0 }
   0xc   :  { %24 = vsyncpa [#allocation5], 0 }
   0xd   :  { %25 = vsyncpa [#allocation16], 0 }
   0xe   :  { %27 = vsyncpa [#allocation16 + $0x1], 0  ;;  %s2791_s27 = smov 0   ;;  %s2793_s28 = smov 0  }
   0xf   :  { %s2795_s29 = smov 0   ;;  %s2797_s30 = smov 0  }
  0x10   :  { %s2799_s9 = smov 0   ;;  %s2801_s10 = smov 0  }
  0x11 LB: > { %3426 = sst [smem:[#allocation24_spill]] %s2713_s29  ;;  %s42_s11 = sadd.s32 1, %s2721_s9  ;;  %s2725_s10 = sphi %s2801_s10, %s33_s10   ;;  %s2721_s9 = sphi %s2799_s9, %s3476_s9   ;;  %s2717_s30 = sphi %s2797_s30, %s3475_s30   ;;  %s2713_s29 = sphi %s2795_s29, %s3471_s29   ;;  %s2709_s28 = sphi %s2793_s28, %s3474_s28   ;;  %s2705_s27 = sphi %s2791_s27, %s3473_s27  }
  0x12   : > { %3427 = sst [smem:[#allocation25_spill]] %s2725_s10  ;;  %s80_s12 = sadd.s32 1, %s2713_s29 }
  0x13   : > { %p43_p0 = scmp.ge.s32.totalorder %s42_s11, 2  ;;  %p3396_p1 = scmp.ne.s32.totalorder %s2713_s29, %s2709_s28 }
  0x14   : > { %p88_p2 = scmp.eq.s32.totalorder %s2725_s10, 0  ;;  %p2298_p5 = scmp.lt.s32.totalorder %s2725_s10, 2 }
  0x15   : > { %s3478_s11 = smov (%p43_p0, %s42_s11), 0  ;;  %s3395_s14 = sand.u32 1, %s2725_s10  }
  0x16   : > { %3428 = sst [smem:[#allocation26_spill]] %s3478_s11  ;;  %p89_p4 = por %p88_p2, %p3396_p1 }
  0x17   : > { %s75_s13 = ssub.s32 %s2721_s9, %s3478_s11  ;;  %s2837_s15 = sand.u32 1, %s2713_s29  }
  0x18   : > { %p78_p6 = scmp.eq.s32.totalorder %s75_s13, 0  ;;  %s1942_s16 = sshll.u32 %s2721_s9, 7 }
  0x19   : > { %s3394_s18 = sshll.u32 %s2837_s15, 3  ;;  %s3430_s1 = sld [smem:[#allocation29_spill]] }
  0x1a   : > { %s2841_s17 = scalar_select %p78_p6, %s2713_s29, %s80_s12  }
  0x1b   : > { %p2851_p7 = pnand %p2298_p5, %p89_p4  ;;  %s324_s23 = scalar_lea.vmem [#allocation6], %s3394_s18 }
  0x1c   : > { %3429 = sst [smem:[#allocation27_spill]] %s2841_s17  ;;  %s332_s24 = sshll.u32 %s324_s23, 4  ;;  %s2857_s24 = int_to_ptr.vmem [resolvable:$true] %s332_s24 }
  0x1d   : > { %s3431_s22 = scalar_select %p2851_p7, 1, 0 }
  0x1e   : > { %s2861_s25 = scalar_lea.sflag [#allocation7], %s3395_s14  ;;  %p2867_p9 = pneg %p2851_p7 }
  0x1f   : > { %s2849_s21 = scalar_lea.hbm %s3430_s1, %s1942_s16  ;;  %s2400_s20 = scalar_lea.hbm %s3430_s1, 256 }
  0x20   : > { %s2395_s26 = scalar_lea.hbm %s2849_s21, 128  ;;  %p2401_p12 = scmp.lt.u32.totalorder %s2849_s21, %s3430_s1 }
  0x21   : > { %p2396_p8 = scmp.ne.s32.totalorder %s2849_s21, %s2395_s26  ;;  %p2402_p13 = scmp.lt.u32.totalorder %s2400_s20, %s2395_s26 }
  0x22   : > { %s3432_s12 = scalar_select %p2867_p9, 1, 0 }
  0x23   : > { %p2398_p10 = pnand %p2867_p9, %p2396_p8  ;;  %p2403_p0 = por %p2402_p13, %p2401_p12 }
  0x24   : > { %p2404_p2 = scmp.lt.u32.totalorder %s2395_s26, %s2849_s21 }
  0x25   : > { %p2399_p11 = pneg %p2398_p10 }
  0x26   : > { %p2405_p4 = por %p2404_p2, %p2403_p0 }
  0x28   : > { %p2406_p5 = pnand %p2405_p4, %p2399_p11 }
  0x2a   : > { %2409 = shalt.err (!%p2406_p5)
}
  0x2b   : > { %s2410_s14 = scalar_lea.vmem %s2857_s24, 128  ;;  %s2727_s13 = smov [#allocation6]  }
  0x2c   : > { %p2411_p6 = scmp.ne.s32.totalorder %s2857_s24, %s2410_s14  ;;  %s2415_s19 = sshll.u32 %s2727_s13, 4  ;;  %s2416_s19 = int_to_ptr.vmem [resolvable:$false] %s2415_s19 }
  0x2d   : > { %s2417_s18 = scalar_lea.vmem %s2416_s19, 256  ;;  %p2418_p3 = scmp.lt.s32.totalorder %s2857_s24, %s2416_s19 }
  0x2e   : > { %p2413_p8 = pnand %p2411_p6, %p2867_p9  ;;  %p2419_p1 = scmp.lt.s32.totalorder %s2417_s18, %s2410_s14 }
  0x30   : > { %p2414_p10 = pneg %p2413_p8  ;;  %p2420_p12 = por %p2419_p1, %p2418_p3 }
  0x32   : > { %p2421_p13 = pnand %p2420_p12, %p2414_p10 }
  0x34   : > { %2424 = shalt.err (!%p2421_p13)
}
  0x35   : > { %2277 = dma.hbm_to_vmem [thread:$0]  (!%p2851_p7), %s2849_s21, 128, %s2857_s24, %s2861_s25  }
  0x36   : > { %s2896_s14 = scalar_lea.hbm %s3387_s2, %s1942_s16  ;;  %s3399_s23 = sshll.u32 %s2837_s15, 5 }
  0x37   : > { %s1994_s13 = sshll.u32 %s2721_s9, 9  ;;  %s3433_s3 = sld [smem:[#allocation30_spill]] }
  0x38   : > { %s362_s11 = scalar_lea.vmem [#allocation9], %s3399_s23  ;;  %s2912_s16 = scalar_lea.hbm %s3389_s4, %s1994_s13 }
  0x39   : > { %s369_s21 = sshll.u32 %s362_s11, 4  ;;  %s3434_s20 = sand.u32 1, %s2725_s10   ;;  %s2907_s21 = int_to_ptr.vmem [resolvable:$true] %s369_s21 }
  0x3a   : > { %s2916_s17 = scalar_lea.sflag [#allocation10], %s3434_s20 }
  0x3d   : > { %s2903_s1 = scalar_lea.hbm %s3433_s3, %s1994_s13  ;;  %s2430_s23 = scalar_lea.hbm %s3433_s3, 1024 }
  0x3e   : > { %s2425_s19 = scalar_lea.hbm %s2903_s1, 512  ;;  %p2431_p0 = scmp.lt.u32.totalorder %s2903_s1, %s3433_s3 }
  0x3f   : > { %p2426_p1 = scmp.ne.s32.totalorder %s2903_s1, %s2425_s19  ;;  %p2432_p2 = scmp.lt.u32.totalorder %s2430_s23, %s2425_s19 }
  0x40   : > { %p2434_p5 = scmp.lt.u32.totalorder %s2425_s19, %s2903_s1 }
  0x41   : > { %p2428_p3 = pnand %p2426_p1, %p2867_p9  ;;  %p2433_p4 = por %p2432_p2, %p2431_p0 }
  0x43   : > { %p2429_p11 = pneg %p2428_p3  ;;  %p2435_p6 = por %p2434_p5, %p2433_p4 }
  0x45   : > { %p2436_p8 = pnand %p2435_p6, %p2429_p11 }
  0x47   : > { %2439 = shalt.err (!%p2436_p8)
}
  0x48   : > { %s2440_s13 = scalar_lea.vmem %s2907_s21, 512  ;;  %s2728_s6 = smov [#allocation9]  }
  0x49   : > { %p2441_p10 = scmp.ne.s32.totalorder %s2907_s21, %s2440_s13  ;;  %s2445_s24 = sshll.u32 %s2728_s6, 4  ;;  %s2446_s24 = int_to_ptr.vmem [resolvable:$false] %s2445_s24 }
  0x4a   : > { %s2447_s8 = scalar_lea.vmem %s2446_s24, 1024  ;;  %p2448_p1 = scmp.lt.s32.totalorder %s2907_s21, %s2446_s24 }
  0x4b   : > { %p2443_p12 = pnand %p2441_p10, %p2867_p9  ;;  %p2449_p3 = scmp.lt.s32.totalorder %s2447_s8, %s2440_s13 }
  0x4d   : > { %p2444_p13 = pneg %p2443_p12  ;;  %p2450_p0 = por %p2449_p3, %p2448_p1 }
  0x4f   : > { %p2451_p2 = pnand %p2450_p0, %p2444_p13 }
  0x51   : > { %2454 = shalt.err (!%p2451_p2)
}
  0x52   : > { %s3402_s23 = smov 128   ;;  %s3404_s26 = smov 8  }
  0x53   : > { %2283 = dma.hbm_to_vmem [thread:$0]  (!%p2851_p7), %s2903_s1, 512, %s2907_s21, %s2916_s17, %s3402_s23, %s3402_s23, %s3404_s26  }
  0x54   : > { %s3435_s20 = sshll.u32 %s2837_s15, 5  ;;  %s2948_s11 = sadd.s32 4294967295, %s2725_s10  }
  0x55   : > { %s383_s19 = scalar_lea.vmem [#allocation11], %s3435_s20  ;;  %s3401_s13 = sadd.s32 4294967294, %s2725_s10  }
  0x56   : > { %s390_s18 = sshll.u32 %s383_s19, 4  ;;  %p93_p11 = scmp.ne.s32.totalorder %s2709_s28, %s2705_s27  ;;  %s2945_s18 = int_to_ptr.vmem [resolvable:$true] %s390_s18 }
  0x57   : > { %p3408_p4 = scmp.eq.s32.totalorder %s2948_s11, 0  ;;  %p3407_p5 = scmp.eq.s32.totalorder %s2948_s11, 1 }
  0x58   : > { %p257_p6 = scmp.eq.s32.totalorder %s3401_s13, 1  ;;  %p1938_p10 = scmp.ge.s32.totalorder %s2725_s10, 1 }
  0x59   : > { %p2959_p8 = por %p3408_p4, %p93_p11  ;;  %p3437_p12 = scmp.ne.s32.totalorder %s2713_s29, %s2709_s28 }
  0x5a   : > { %p2973_p1 = por %p257_p6, %p93_p11  ;;  %p292_p3 = scmp.lt.s32.totalorder %s2725_s10, 3 }
  0x5b   : > { %s3436_s1 = scalar_select %p2959_p8, 1, 0 }
  0x5c   : > { %p2969_p13 = por %p3407_p5, %p3437_p12  ;;  %s3441_s6 = sshll.u32 %s2837_s15, 3 }
  0x5d   : > { %s3439_s27 = scalar_select %p2973_p1, 1, 0 }
  0x5e   : > { %s3438_s21 = scalar_select %p2969_p13, 1, 0 }
  0x5f   : > { %3440 = sst [smem:[#allocation28_spill]] %s3439_s27  ;;  %s343_s24 = scalar_lea.vmem [#allocation8], %s3441_s6 }
  0x60   : > { %s351_s8 = sshll.u32 %s343_s24, 4  ;;  %p2980_p0 = pnand %p1938_p10, %p292_p3  ;;  %s352_s8 = int_to_ptr.vmem [resolvable:$true] %s351_s8 }
  0x61   : > { %s2731_s19 = smov [#allocation3]   ;;  %s2455_s23 = scalar_lea.hbm %s2896_s14, 128 }
  0x62   : > { %s3442_s20 = scalar_select %p2980_p0, 1, 0 }
  0x63   : > { %s306_s13 = sshll.u32 %s2731_s19, 4  ;;  %p2456_p11 = scmp.ne.s32.totalorder %s2896_s14, %s2455_s23  ;;  %s2984_s13 = int_to_ptr.vmem [resolvable:$true] %s306_s13 }
  0x64   : > { %s2460_s24 = scalar_lea.hbm %s3387_s2, 256  ;;  %p2461_p10 = scmp.lt.u32.totalorder %s2896_s14, %s3387_s2 }
  0x65   : > { %p2458_p6 = pnand %p2456_p11, %p2867_p9  ;;  %p2462_p3 = scmp.lt.u32.totalorder %s2460_s24, %s2455_s23 }
  0x66   : > { %p2464_p4 = scmp.lt.u32.totalorder %s2455_s23, %s2896_s14 }
  0x67   : > { %p2459_p12 = pneg %p2458_p6  ;;  %p2463_p5 = por %p2462_p3, %p2461_p10 }
  0x69   : > { %p2465_p1 = por %p2464_p4, %p2463_p5 }
  0x6b   : > { %p2466_p13 = pnand %p2465_p1, %p2459_p12 }
  0x6d   : > { %2469 = shalt.err (!%p2466_p13)
}
  0x6e   : > { %s2470_s19 = scalar_lea.vmem %s352_s8, 128  ;;  %s2732_s27 = smov [#allocation8]  }
  0x6f   : > { %p2471_p2 = scmp.ne.s32.totalorder %s352_s8, %s2470_s19  ;;  %s2475_s10 = sshll.u32 %s2732_s27, 4  ;;  %s2476_s10 = int_to_ptr.vmem [resolvable:$false] %s2475_s10 }
  0x70   : > { %s2477_s26 = scalar_lea.vmem %s2476_s10, 256  ;;  %p2478_p8 = scmp.lt.s32.totalorder %s352_s8, %s2476_s10 }
  0x71   : > { %p2473_p11 = pnand %p2471_p2, %p2867_p9  ;;  %p2479_p0 = scmp.lt.s32.totalorder %s2477_s26, %s2470_s19 }
  0x73   : > { %p2474_p6 = pneg %p2473_p11  ;;  %p2480_p7 = por %p2479_p0, %p2478_p8 }
  0x75   : > { %p2481_p3 = pnand %p2480_p7, %p2474_p6 }
  0x77   : > { %2484 = shalt.err (!%p2481_p3)
}
  0x78   : > { %p3443_p10 = scmp.ne.s32.totalorder %s3431_s22, 0  ;;  %p3444_p4 = scmp.eq.s32.totalorder %s2948_s11, 0 }
  0x79   : > { %p3445_p5 = scmp.ne.s32.totalorder %s3442_s20, 0  ;;  %s2485_s29 = scalar_lea.hbm %s2912_s16, 512 }
  0x7a   : > { %2280 = dma.hbm_to_vmem [thread:$0]  (!%p3443_p10), %s2896_s14, 128, %s352_s8, %s2861_s25  }
  0x7b   : > { %p3446_p13 = pneg %p3445_p5  ;;  %p2486_p7 = scmp.ne.s32.totalorder %s2912_s16, %s2485_s29 }
  0x7c   : > { %s2490_s27 = scalar_lea.hbm %s3389_s4, 1024  ;;  %p2491_p2 = scmp.lt.u32.totalorder %s2912_s16, %s3389_s4 }
  0x7d   : > { %p3011_p1 = pnand %p3446_p13, %p3444_p4  ;;  %p2488_p8 = pnand %p2486_p7, %p2867_p9 }
  0x7e   : > { %p2492_p12 = scmp.lt.u32.totalorder %s2490_s27, %s2485_s29  ;;  %p2494_p6 = scmp.lt.u32.totalorder %s2485_s29, %s2912_s16 }
  0x7f   : > { %s3447_s3 = scalar_select %p3011_p1, 1, 0 }
  0x80   : > { %p2489_p0 = pneg %p2488_p8  ;;  %p2493_p11 = por %p2492_p12, %p2491_p2 }
  0x82   : > { %p2495_p3 = por %p2494_p6, %p2493_p11 }
  0x84   : > { %p2496_p4 = pnand %p2495_p3, %p2489_p0 }
  0x86   : > { %2499 = shalt.err (!%p2496_p4)
}
  0x87   : > { %s2500_s25 = scalar_lea.vmem %s2945_s18, 512  ;;  %s2733_s14 = smov [#allocation11]  }
  0x88   : > { %p2501_p13 = scmp.ne.s32.totalorder %s2945_s18, %s2500_s25  ;;  %s2505_s8 = sshll.u32 %s2733_s14, 4  ;;  %s2506_s8 = int_to_ptr.vmem [resolvable:$false] %s2505_s8 }
  0x89   : > { %s2507_s19 = scalar_lea.vmem %s2506_s8, 1024  ;;  %p2508_p5 = scmp.lt.s32.totalorder %s2945_s18, %s2506_s8 }
  0x8a   : > { %p2503_p7 = pnand %p2501_p13, %p2867_p9  ;;  %p2509_p1 = scmp.lt.s32.totalorder %s2507_s19, %s2500_s25 }
  0x8c   : > { %p2504_p8 = pneg %p2503_p7  ;;  %p2510_p2 = por %p2509_p1, %p2508_p5 }
  0x8e   : > { %p2511_p12 = pnand %p2510_p2, %p2504_p8 }
  0x90   : > { %2514 = shalt.err (!%p2511_p12)
}
  0x91   : > { %s3448_s26 = smov 8   ;;  %s3449_s29 = smov 128  }
  0x92   : > { %2286 = dma.hbm_to_vmem [thread:$0]  (!%p3443_p10), %s2912_s16, 512, %s2945_s18, %s2916_s17, %s3449_s29, %s3449_s29, %s3448_s26  }
  0x93   : > { %s1951_s10 = sshll.u32 %s2721_s9, 4  ;;  %s2515_s6 = scalar_lea.hbm %s3385_s0, 1024 }
  0x94   : > { %p2516_p5 = scmp.ne.s32.totalorder %s3385_s0, %s2515_s6  ;;  %p3450_p1 = scmp.ne.s32.totalorder %s3447_s3, 0 }
  0x95   : > { %p2522_p3 = scmp.lt.u32.totalorder %s2515_s6, %s3385_s0 }
  0x96   : > { %p2517_p0 = pneg %p3450_p1 }
  0x98   : > { %p2518_p11 = pnand %p2517_p0, %p2516_p5 }
  0x9a   : > { %p2519_p6 = pneg %p2518_p11 }
  0x9c   : > { %p2524_p4 = pnand %p2522_p3, %p2519_p6 }
  0x9e   : > { %2527 = shalt.err (!%p2524_p4)
}
  0x9f   : > { %s2528_s17 = scalar_lea.vmem %s2984_s13, 1024  ;;  %p2536_p2 = scmp.lt.s32.totalorder %s2984_s13, %s2984_s13 }
  0xa0   : > { %p2529_p13 = scmp.ne.s32.totalorder %s2984_s13, %s2528_s17  ;;  %p2537_p12 = scmp.lt.s32.totalorder %s2528_s17, %s2528_s17 }
  0xa2   : > { %p2531_p7 = pnand %p2529_p13, %p2517_p0  ;;  %p2538_p10 = por %p2537_p12, %p2536_p2 }
  0xa4   : > { %p2532_p8 = pneg %p2531_p7 }
  0xa6   : > { %p2539_p9 = pnand %p2538_p10, %p2532_p8 }
  0xa8   : > { %2542 = shalt.err (!%p2539_p9)
}
  0xa9   : > { %2273 = dma.hbm_to_vmem [thread:$0]  (!%p3450_p1), %s3385_s0, 1024, %s2984_s13, [#allocation4], %s3449_s29, %s3449_s29, %s3448_s26  }
  0xaa   : > { %s3068_s27 = scalar_lea.hbm %s3390_s5, %s1951_s10  ;;  %s403_s3 = scalar_lea.vmem [#allocation12], %s2837_s15 }
  0xab   : > { %s410_s6 = sshll.u32 %s403_s3, 4  ;;  %s401_s24 = scalar_lea.sflag [#allocation13], %s2837_s15  ;;  %s411_s6 = int_to_ptr.vmem [resolvable:$true] %s410_s6 }
  0xac   : > { %s2543_s25 = scalar_lea.hbm %s3068_s27, 16  ;;  %p3451_p10 = scmp.ne.s32.totalorder %s3432_s12, 0 }
  0xad   : > { %p2544_p9 = scmp.ne.s32.totalorder %s3068_s27, %s2543_s25  ;;  %s2548_s26 = scalar_lea.hbm %s3390_s5, 32 }
  0xae   : > { %p2549_p1 = scmp.lt.u32.totalorder %s3068_s27, %s3390_s5  ;;  %p2550_p11 = scmp.lt.u32.totalorder %s2548_s26, %s2543_s25 }
  0xaf   : > { %p2546_p5 = pnand %p2544_p9, %p3451_p10  ;;  %p2552_p3 = scmp.lt.u32.totalorder %s2543_s25, %s3068_s27 }
  0xb0   : > { %p2551_p6 = por %p2550_p11, %p2549_p1 }
  0xb1   : > { %p2547_p0 = pneg %p2546_p5 }
  0xb2   : > { %p2553_p4 = por %p2552_p3, %p2551_p6 }
  0xb4   : > { %p2554_p13 = pnand %p2553_p4, %p2547_p0 }
  0xb6   : > { %2557 = shalt.err (!%p2554_p13)
}
  0xb7   : > { %s2558_s15 = scalar_lea.vmem %s411_s6, 16  ;;  %s2734_s8 = smov [#allocation12]  }
  0xb8   : > { %p2559_p7 = scmp.ne.s32.totalorder %s411_s6, %s2558_s15  ;;  %s2563_s17 = sshll.u32 %s2734_s8, 4  ;;  %s2564_s17 = int_to_ptr.vmem [resolvable:$false] %s2563_s17 }
  0xb9   : > { %s2565_s16 = scalar_lea.vmem %s2564_s17, 32  ;;  %p2566_p12 = scmp.lt.s32.totalorder %s411_s6, %s2564_s17 }
  0xba   : > { %p2561_p8 = pnand %p2559_p7, %p3451_p10  ;;  %p2567_p9 = scmp.lt.s32.totalorder %s2565_s16, %s2558_s15 }
  0xbc   : > { %p2562_p2 = pneg %p2561_p8  ;;  %p2568_p5 = por %p2567_p9, %p2566_p12 }
  0xbe   : > { %p2569_p1 = pnand %p2568_p5, %p2562_p2 }
  0xc0   : > { %2572 = shalt.err (!%p2569_p1)
}
  0xc1   : > { %p3452_p11 = scmp.ne.s32.totalorder %s3431_s22, 0  ;;  %p3453_p0 = scmp.ne.s32.totalorder %s3442_s20, 0 }
  0xc2   : > { %p3454_p6 = scmp.eq.s32.totalorder (!%p3453_p0), %s2948_s11, 0 }
  0xc3   : > { %2289 = dma.hbm_to_vmem [thread:$0]  (!%p3452_p11), %s3068_s27, 16, %s411_s6, %s401_s24  }
  0xc4   : > { %419 = sbr.rel (%p3453_p0) target bundleno = 6373 (0x18e5), region = 44 }
  0xcb   : > { %2680 = dma.done.wait (%p3454_p6), [#allocation4], 1024   ;;  %p3455_p10 = pmov %p3454_p6 }
  0xcc   : > { %s3096_s12 = sand.u32 1, %s2948_s11   ;;  %s427_s18 = sand.u32 1, %s2709_s28  }
  0xcd   : > { %2682 = vsyncadd (%p3455_p10), [#allocation4], 4294966272  ;;  %s3099_s19 = sshll.u32 %s427_s18, 3  ;;  %s426_s22 = scalar_lea.sflag [#allocation7], %s3096_s12 }
  0xce   : > { %s429_s23 = scalar_lea.vmem [#allocation6], %s3099_s19  ;;  %p3456_p3 = scmp.ne.s32.totalorder %s3436_s1, 0 }
  0xd0   : > { %2684 = dma.done.wait (%p3456_p3), %s426_s22, 256  }
  0xd1   : > { %2686 = vsyncadd (%p3456_p3), %s426_s22, 4294967040  ;;  %s1956_s20 = sshll.u32 %s427_s18, 5  ;;  %s438_s27 = scalar_lea.vmem [#allocation8], %s3099_s19 }
  0xd2   : > { %s444_s3 = scalar_lea.sflag [#allocation10], %s3096_s12  ;;  %s3109_s6 = scalar_lea.vmem [#allocation9], %s1956_s20 }
  0xd3   : > { %2688 = dma.done.wait (%p3456_p3), %s444_s3, 1024  }
  0xd4   : > { %2690 = vsyncadd (%p3456_p3), %s444_s3, 4294966272  ;;  %s3115_s24 = scalar_lea.vmem [#allocation11], %s1956_s20  ;;  %s462_s25 = scalar_lea.sflag [#allocation13], %s427_s18 }
  0xd5   : > { %s464_s14 = scalar_lea.vmem [#allocation12], %s427_s18 }
  0xd6   : > { %2692 = dma.done.wait (%p3456_p3), %s462_s25, 16  }
  0xd7   : > { %2694 = vsyncadd (%p3456_p3), %s462_s25, 4294967280  ;;  %v3121_v0 = vld [vmem:[%s464_s14] sm:$0x1]  ;;  %s513_s13 = scalar_lea.vmem [#allocation15], %s3099_s19  ;;  %s520_s26 = scalar_lea.vmem [#allocation17], %s3099_s19 }
  0xd8   : > { %p1960_p4 = scmp.ne.s32.totalorder %s2717_s30, 0 }
  0xd9   : > { %v534_v1 = vld [vmem:[%s3109_s6] sm:$0xff] (!%p1960_p4)  ;;  %v535_v2 = vld [vmem:[%s3109_s6 + $0x8] sm:$0xff] (!%p1960_p4)  ;;  %vm542_vm0 = vcmask (!%p1960_p4), 130048   ;;  %v528_v8 = vld [vmem:[#allocation3 + $0x10] sm:$0xff] (!%p1960_p4)  ;;  %v537_v12 = vlaneseq (!%p1960_p4) }
  0xda   : > { %525 = sbr.rel (%p1960_p4) target bundleno = 445 (0x1bd), region = 72  ;;  %v526_v3 = vld [vmem:[#allocation3] sm:$0xff] (!%p1960_p4)  ;;  %v2182_v4 = vpack.c.bf16 (!%p1960_p4), %v535_v2, %v534_v1  ;;  %v527_v6 = vld [vmem:[#allocation3 + $0x8] sm:$0xff] (!%p1960_p4)  ;;  %v532_v9 = vld [vmem:[#allocation3 + $0x30] sm:$0xff] (!%p1960_p4) }
  0xdb   : > { %2062 = vmatprep.mubr.msk.f32.mxu0 (!%p1960_p4), %vm542_vm0, %v526_v3  ;;  %v530_v5 = vld [vmem:[#allocation3 + $0x20] sm:$0xff] (!%p1960_p4)  ;;  %v531_v7 = vld [vmem:[#allocation3 + $0x28] sm:$0xff] (!%p1960_p4)  ;;  %v529_v10 = vld [vmem:[#allocation3 + $0x18] sm:$0xff] (!%p1960_p4)  ;;  %v538_v13 = vshrl.u32 (!%p1960_p4), %v537_v12, 7 }
  0xdc   : > { %2068 = vmatprep.mubr.msk.f32.mxu1 (!%p1960_p4), %vm542_vm0, %v530_v5  ;;  %2183 = vmatprep.subr.bf16.mxu0 (!%p1960_p4), %v2182_v4  ;;  %v533_v11 = vld [vmem:[#allocation3 + $0x38] sm:$0xff] (!%p1960_p4) }
  0xdd   : > { %2242 = vmatprep.subr.bf16.mxu1 (!%p1960_p4), %v2182_v4  ;;  %2185 = vmatpush3.bf16.msra.mxu0 (!%p1960_p4), %v2182_v4  ;;  %v539_v14 = vsub.s32 (!%p1960_p4), 0, %v538_v13 }
  0xde   : > { %2243 = vmatpush3.bf16.msra.mxu1 (!%p1960_p4), %v2182_v4 }
  0xdf   : > { %v540_v15 = vrot.slane (!%p1960_p4), %v3121_v0, %v539_v14 }
  0xe0   : > { %2063 = vmatmul.mubr.msk.f32.vlgmr.msra.gmra.mrb[0].mxu0 (!%p1960_p4), %vm542_vm0, %v527_v6 }
  0xe1   : > { %2069 = vmatmul.mubr.msk.f32.vlgmr.msra.gmra.mrb[0].mxu1 %vm542_vm0, %v531_v7  ;;  %2065 = vmatprep.mubr.msk.f32.mxu0 %vm542_vm0, %v528_v8 }
  0xe2   : > { %2071 = vmatprep.mubr.msk.f32.mxu1 %vm542_vm0, %v532_v9 }
  0xe4   : > { %2066 = vmatmul.mubr.msk.f32.gmra.mrb[2].mxu0 %vm542_vm0, %v529_v10 }
  0xe5   : > { %2072 = vmatmul.mubr.msk.f32.gmra.mrb[2].mxu1 %vm542_vm0, %v533_v11 }
 0x1b3   : > { %v2064_v16 = vpop.f32.mrb[0].mxu0 }
 0x1b4   : > { %v2070_v17 = vpop.f32.mrb[0].mxu1  ;;  %v639_v18 = vadd.f32 %v2064_v16, %v540_v15  ;;  %v633_v20 = vpop.f32.mrb[1].mxu0 }
 0x1b5   : > { %v659_v19 = vadd.f32 %v2070_v17, %v540_v15  ;;  %v653_v21 = vpop.f32.mrb[1].mxu1  ;;  %v634_v22 = vadd.f32 %v633_v20, %v540_v15 }
 0x1b6   : > { %v654_v23 = vadd.f32 %v653_v21, %v540_v15  ;;  %673 = vst [vmem:[#allocation2 + $0x8] sm:$0xff] %v639_v18 }
 0x1b7   : > { %677 = vst [vmem:[#allocation2 + $0x28] sm:$0xff] %v659_v19  ;;  %672 = vst [vmem:[#allocation2] sm:$0xff] %v634_v22  ;;  %v2067_v24 = vpop.f32.mrb[2].mxu0 }
 0x1b8   : > { %676 = vst [vmem:[#allocation2 + $0x20] sm:$0xff] %v654_v23  ;;  %v2073_v25 = vpop.f32.mrb[2].mxu1  ;;  %v649_v26 = vadd.f32 %v2067_v24, %v540_v15  ;;  %v643_v28 = vpop.f32.mrb[3].mxu0 }
 0x1b9   : > { %v669_v27 = vadd.f32 %v2073_v25, %v540_v15  ;;  %v663_v29 = vpop.f32.mrb[3].mxu1  ;;  %v644_v30 = vadd.f32 %v643_v28, %v540_v15 }
 0x1ba   : > { %v664_v31 = vadd.f32 %v663_v29, %v540_v15  ;;  %675 = vst [vmem:[#allocation2 + $0x18] sm:$0xff] %v649_v26 }
 0x1bb   : > { %679 = vst [vmem:[#allocation2 + $0x38] sm:$0xff] %v669_v27  ;;  %674 = vst [vmem:[#allocation2 + $0x10] sm:$0xff] %v644_v30 }
 0x1bc   : > { %678 = vst [vmem:[#allocation2 + $0x30] sm:$0xff] %v664_v31 }
 0x1bd PF: > { %p1969_p13 = scmp.le.s32.totalorder %s2717_s30, 0 }
 0x1be   : > { %v692_v32 = vld [vmem:[%s3109_s6] sm:$0xff] (!%p1969_p13)  ;;  %v693_v33 = vld [vmem:[%s3109_s6 + $0x8] sm:$0xff] (!%p1969_p13)  ;;  %v694_v34 = vld [vmem:[%s3109_s6 + $0x10] sm:$0xff] (!%p1969_p13)  ;;  %vm702_vm1 = vcmask (!%p1969_p13), 261120   ;;  %v697_v46 = vlaneseq (!%p1969_p13) }
 0x1bf   : > { %683 = sbr.rel (%p1969_p13) target bundleno = 678 (0x2a6), region = 76  ;;  %v2186_v35 = vpack.c.bf16 (!%p1969_p13), %v693_v33, %v692_v32  ;;  %v695_v36 = vld [vmem:[%s3109_s6 + $0x18] sm:$0xff] (!%p1969_p13)  ;;  %v684_v37 = vld [vmem:[#allocation14] sm:$0xff] (!%p1969_p13)  ;;  %v685_v40 = vld [vmem:[#allocation14 + $0x8] sm:$0xff] (!%p1969_p13) }
 0x1c0   : > { %v688_v38 = vld [vmem:[#allocation14 + $0x20] sm:$0xff] (!%p1969_p13)  ;;  %v2190_v39 = vpack.c.bf16 (!%p1969_p13), %v695_v36, %v694_v34  ;;  %2082 = vmatprep.mubr.msk.f32.mxu0 (!%p1969_p13), %vm702_vm1, %v684_v37  ;;  %v689_v41 = vld [vmem:[#allocation14 + $0x28] sm:$0xff] (!%p1969_p13)  ;;  %v686_v42 = vld [vmem:[#allocation14 + $0x10] sm:$0xff] (!%p1969_p13)  ;;  %v698_v47 = vshrl.u32 (!%p1969_p13), %v697_v46, 7 }
 0x1c1   : > { %2088 = vmatprep.mubr.msk.f32.mxu1 (!%p1969_p13), %vm702_vm1, %v688_v38  ;;  %2187 = vmatprep.subr.bf16.mxu0 (!%p1969_p13), %v2186_v35  ;;  %v690_v43 = vld [vmem:[#allocation14 + $0x30] sm:$0xff] (!%p1969_p13)  ;;  %v687_v44 = vld [vmem:[#allocation14 + $0x18] sm:$0xff] (!%p1969_p13) }
 0x1c2   : > { %2244 = vmatprep.subr.bf16.mxu1 (!%p1969_p13), %v2186_v35  ;;  %2189 = vmatpush3.bf16.msra.mxu0 (!%p1969_p13), %v2186_v35  ;;  %v691_v45 = vld [vmem:[#allocation14 + $0x38] sm:$0xff] (!%p1969_p13)  ;;  %v699_v48 = vsub.s32 (!%p1969_p13), 0, %v698_v47 }
 0x1c3   : > { %2246 = vmatpush3.bf16.msra.mxu1 (!%p1969_p13), %v2186_v35  ;;  %2191 = vmatprep.subr.bf16.mxu0 (!%p1969_p13), %v2190_v39 }
 0x1c4   : > { %2245 = vmatprep.subr.bf16.mxu1 (!%p1969_p13), %v2190_v39  ;;  %v700_v49 = vrot.slane (!%p1969_p13), %v3121_v0, %v699_v48 }
 0x1c6   : > { %2193 = vmatpush3.bf16.msra.mxu0 %v2190_v39 }
 0x1c7   : > { %2247 = vmatpush3.bf16.msra.mxu1 %v2190_v39 }
 0x1c9   : > { %2083 = vmatmul.mubr.msk.f32.vlgmr.msra.gmra.mrb[0].mxu0 %vm702_vm1, %v685_v40 }
 0x1ca   : > { %2089 = vmatmul.mubr.msk.f32.vlgmr.msra.gmra.mrb[0].mxu1 %vm702_vm1, %v689_v41  ;;  %2085 = vmatprep.mubr.msk.f32.mxu0 %vm702_vm1, %v686_v42 }
 0x1cb   : > { %2091 = vmatprep.mubr.msk.f32.mxu1 %vm702_vm1, %v690_v43 }
 0x1cd   : > { %2086 = vmatmul.mubr.msk.f32.gmra.mrb[2].mxu0 %vm702_vm1, %v687_v44 }
 0x1ce   : > { %2092 = vmatmul.mubr.msk.f32.gmra.mrb[2].mxu1 %vm702_vm1, %v691_v45 }
 0x29c   : > { %v2084_v50 = vpop.f32.mrb[0].mxu0 }
 0x29d   : > { %v2090_v51 = vpop.f32.mrb[0].mxu1  ;;  %v799_v52 = vadd.f32 %v2084_v50, %v700_v49  ;;  %v793_v54 = vpop.f32.mrb[1].mxu0 }
 0x29e   : > { %v819_v53 = vadd.f32 %v2090_v51, %v700_v49  ;;  %v813_v55 = vpop.f32.mrb[1].mxu1  ;;  %v794_v56 = vadd.f32 %v793_v54, %v700_v49 }
 0x29f   : > { %v814_v57 = vadd.f32 %v813_v55, %v700_v49  ;;  %833 = vst [vmem:[#allocation2 + $0x8] sm:$0xff] %v799_v52 }
 0x2a0   : > { %837 = vst [vmem:[#allocation2 + $0x28] sm:$0xff] %v819_v53  ;;  %832 = vst [vmem:[#allocation2] sm:$0xff] %v794_v56  ;;  %v2087_v58 = vpop.f32.mrb[2].mxu0 }
 0x2a1   : > { %836 = vst [vmem:[#allocation2 + $0x20] sm:$0xff] %v814_v57  ;;  %v2093_v59 = vpop.f32.mrb[2].mxu1  ;;  %v809_v60 = vadd.f32 %v2087_v58, %v700_v49  ;;  %v803_v62 = vpop.f32.mrb[3].mxu0 }
 0x2a2   : > { %v829_v61 = vadd.f32 %v2093_v59, %v700_v49  ;;  %v823_v63 = vpop.f32.mrb[3].mxu1  ;;  %v804_v1 = vadd.f32 %v803_v62, %v700_v49 }
 0x2a3   : > { %v824_v0 = vadd.f32 %v823_v63, %v700_v49  ;;  %835 = vst [vmem:[#allocation2 + $0x18] sm:$0xff] %v809_v60 }
 0x2a4   : > { %839 = vst [vmem:[#allocation2 + $0x38] sm:$0xff] %v829_v61  ;;  %834 = vst [vmem:[#allocation2 + $0x10] sm:$0xff] %v804_v1 }
 0x2a5   : > { %838 = vst [vmem:[#allocation2 + $0x30] sm:$0xff] %v824_v0 }
 0x2a6 PF: > { %v840_v2 = vld [vmem:[%s3115_s24] sm:$0xff]  ;;  %v841_v3 = vld [vmem:[%s3115_s24 + $0x8] sm:$0xff]  ;;  %v842_v4 = vld [vmem:[%s3115_s24 + $0x10] sm:$0xff]  ;;  %v2735_v5 = vmov 0.0|0.0   ;;  %vm2736_vm2 = vmmov 0   ;;  %v2737_v8 = vmov 0.0  }
 0x2a7   : > { %2194 = vmatprep.subr.bf16.mxu0 %v2735_v5  ;;  %v3155_v6 = vpack.c.bf16 %v841_v3, %v840_v2  ;;  %v843_v7 = vld [vmem:[%s3115_s24 + $0x18] sm:$0xff]  ;;  %2102 = vmatprep.mubr.msk.f32.mxu0 %vm2736_vm2, %v2737_v8  ;;  %v844_v10 = vld [vmem:[%s429_s23] sm:$0xff]  ;;  %vm847_vm3 = vcmask 261120   ;;  %s2738_s1 = smov 64   ;;  %s2739_s29 = smov 32  }
 0x2a8   : > { %2200 = vmatprep.subr.bf16.mxu1 %v2735_v5  ;;  %2113 = vmatprep.mubr.msk.f32.mxu1 %vm2736_vm2, %v2737_v8  ;;  %v3164_v9 = vpack.c.bf16 %v843_v7, %v842_v4  ;;  %v846_v11 = vld [vmem:[#allocation2] sm:$0xff]  ;;  %v845_v16 = vld [vmem:[%s438_s27] sm:$0xff]  ;;  %v952_v29 = vld [vmem:[#allocation2 + $0x8] sm:$0xff]  ;;  %s2740_s10 = smov 96   ;;  %s1989_s15 = sshll.u32 %s2717_s30, 7 }
 0x2a9   : > { %2196 = vmatpush3.bf16.msra.mxu0 %v3155_v6  ;;  %2202 = vmatpush3.bf16.msra.mxu1 %v3155_v6  ;;  %s1699_s8 = sshll.u32 %s513_s13, 4  ;;  %s2741_s17 = smov [#allocation14]   ;;  %s3272_s8 = int_to_ptr.vmem [resolvable:$true] %s1699_s8 }
 0x2aa   : > { %2197 = vmatprep.subr.bf16.mxu0 %v2735_v5  ;;  %2203 = vmatprep.subr.bf16.mxu1 %v2735_v5  ;;  %v1154_v61 = vld [vmem:[#allocation2 + $0x18] sm:$0xff]  ;;  %s1682_s16 = sshll.u32 %s2741_s17, 4  ;;  %s3268_s23 = scalar_lea.hbm %s3392_s7, %s1989_s15  ;;  %s3274_s16 = int_to_ptr.vmem [resolvable:$true] %s1682_s16 }
 0x2ab   : > { %v1053_v45 = vld [vmem:[#allocation2 + $0x10] sm:$0xff]  ;;  %s1713_s20 = sshll.u32 %s520_s26, 4  ;;  %s3457_s3 = sld [smem:[#allocation32_spill]]  ;;  %s3285_s20 = int_to_ptr.vmem [resolvable:$true] %s1713_s20 }
 0x2ac   : > { %s1665_s24 = scalar_lea.sflag [#allocation16], %s3096_s12  ;;  %s2573_s25 = scalar_lea.vmem %s3272_s8, 128 }
 0x2ad   : > { %2199 = vmatpush3.bf16.msra.mxu0 %v3164_v9  ;;  %2205 = vmatpush3.bf16.msra.mxu1 %v3164_v9  ;;  %p2574_p7 = scmp.ne.s32.totalorder %s3272_s8, %s2573_s25  ;;  %p3458_p8 = scmp.ne.s32.totalorder %s3438_s21, 0 }
 0x2ae   : > { %2206 = vmatprep.subr.bf16.mxu0 %v2735_v5  ;;  %2212 = vmatprep.subr.bf16.mxu1 %v2735_v5  ;;  %s2742_s14 = smov [#allocation15]  }
 0x2af   : > { %p2575_p2 = pnand %p2574_p7, %p3458_p8 }
 0x2b0   : > { %2103 = vmatmul.mubr.msk.f32.vlgmr.msra.gmra.mrb[0].mxu0 %vm847_vm3, %v844_v10 }
 0x2b1   : > { %2208 = vmatpush3.bf16.msra.mxu0 %v3155_v6  ;;  %2124 = vmatprep.mubr.msk.f32.mxu0 %vm2736_vm2, %v2737_v8  ;;  %s3283_s6 = scalar_lea.hbm %s3457_s3, %s1989_s15  ;;  %p2576_p12 = pneg %p2575_p2 }
 0x2b2   : > { %2209 = vmatprep.subr.bf16.mxu0 %v2735_v5 }
 0x2b5   : > { %2211 = vmatpush3.bf16.msra.mxu0 %v3164_v9 }
 0x2b6   : > { %2218 = vmatprep.subr.bf16.mxu0 %v2735_v5 }
 0x383   : > { %v917_v12 = vpop.f32.mrb[0].mxu0 }
 0x384   : > { %v921_v13 = vadd.f32 %v917_v12, %v846_v11  ;;  %v2104_v14 = vpop.f32.mrb[1].mxu0 }
 0x386   : > { %2363 = vtanh.f32 %v921_v13 }
 0x390   : > { %v2364_v15 = vpop.eup %2363 }
 0x391   : > { %931 = vrot.lane.b32.xlu0 %v2364_v15, %s2738_s1  ;;  %v923_v17 = vmul.f32 0.5, %v2364_v15 }
 0x393   : > { %v924_v18 = vadd.f32 0.5, %v923_v17  ;;  %v1255_v17 = vld [vmem:[#allocation2 + $0x20] sm:$0xff] }
 0x395   : > { %926 = vrot.lane.b32.xlu0 %v845_v16, %s2739_s29 }
 0x403   : > { %v932_v19 = vpop.permute.xlu0 %931 }
 0x404   : > { %v934_v20 = vmul.f32 %v932_v19, %v924_v18 }
 0x406   : > { %936 = vrot.lane.b32.xlu1 %v934_v20, %s2739_s29 }
 0x407   : > { %v927_v21 = vpop.permute.xlu0 %926 }
 0x408   : > { %v929_v22 = vmul.f32 %v927_v21, %v924_v18 }
 0x478   : > { %v937_v23 = vpop.permute.xlu1 %936 }
 0x479   : > { %v939_v24 = vadd.f32 %v937_v23, %v929_v22 }
 0x47b   : > { %2365 = vtanh.f32 %v939_v24 }
 0x485   : > { %v2366_v25 = vpop.eup %2365 }
 0x486   : > { %942 = vrot.lane.b32.xlu1 %v2366_v25, %s2738_s1 }
 0x4f8   : > { %v943_v26 = vpop.permute.xlu1 %942 }
 0x4f9   : > { %v945_v27 = vmul.f32 %v943_v26, %v924_v18 }
 0x4fb   : > { %947 = vrot.lane.b32.xlu0 %v945_v27, %s2739_s29 }
 0x56d   : > { %v948_v28 = vpop.permute.xlu0 %947 }
 0x56e   : > { %950 = vst.msk [vmem:[#allocation14] sm:$0xff] %vm847_vm3, %v948_v28  ;;  %2114 = vmatmul.mubr.msk.f32.vlgmr.msra.gmra.mrb[0].mxu1 %vm847_vm3, %v948_v28 }
 0x56f   : > { %2214 = vmatpush3.bf16.msra.mxu1 %v3155_v6  ;;  %2135 = vmatprep.mubr.msk.f32.mxu1 %vm2736_vm2, %v2737_v8 }
 0x570   : > { %2215 = vmatprep.subr.bf16.mxu1 %v2735_v5 }
 0x573   : > { %2217 = vmatpush3.bf16.msra.mxu1 %v3164_v9 }
 0x574   : > { %2224 = vmatprep.subr.bf16.mxu1 %v2735_v5 }
 0x641   : > { %v1021_v30 = vpop.f32.mrb[0].mxu1 }
 0x642   : > { %v1025_v31 = vadd.f32 %v1021_v30, %v952_v29  ;;  %v2115_v32 = vpop.f32.mrb[1].mxu1 }
 0x644   : > { %2367 = vtanh.f32 %v1025_v31 }
 0x64e   : > { %v2368_v33 = vpop.eup %2367 }
 0x64f   : > { %1031 = vrot.lane.b32.xlu1 %v2368_v33, %s2738_s1  ;;  %v1027_v34 = vmul.f32 0.5, %v2368_v33  ;;  %v1356_v33 = vld [vmem:[#allocation2 + $0x28] sm:$0xff] }
 0x651   : > { %v1028_v35 = vadd.f32 0.5, %v1027_v34 }
 0x653   : > { %v1029_v38 = vmul.f32 %v1028_v35, %v939_v24 }
 0x6c1   : > { %v1032_v36 = vpop.permute.xlu1 %1031 }
 0x6c2   : > { %v1034_v37 = vmul.f32 %v1032_v36, %v1028_v35 }
 0x6c4   : > { %1036 = vrot.lane.b32.xlu0 %v1034_v37, %s2739_s29 }
 0x736   : > { %v1037_v39 = vpop.permute.xlu0 %1036 }
 0x737   : > { %v1039_v40 = vadd.f32 %v1037_v39, %v1029_v38 }
 0x739   : > { %2369 = vtanh.f32 %v1039_v40 }
 0x743   : > { %v2370_v41 = vpop.eup %2369 }
 0x744   : > { %1042 = vrot.lane.b32.xlu1 %v2370_v41, %s2738_s1 }
 0x7b6   : > { %v1043_v42 = vpop.permute.xlu1 %1042 }
 0x7b7   : > { %v1045_v43 = vmul.f32 %v1043_v42, %v1028_v35 }
 0x7b9   : > { %1047 = vrot.lane.b32.xlu0 %v1045_v43, %s2739_s29 }
 0x82b   : > { %v1048_v44 = vpop.permute.xlu0 %1047 }
 0x82c   : > { %1051 = vst.msk [vmem:[#allocation14 + $0x8] sm:$0xff] %vm847_vm3, %v1048_v44  ;;  %2125 = vmatmul.mubr.msk.f32.vlgmr.msra.gmra.mrb[2].mxu0 %vm847_vm3, %v1048_v44 }
 0x82d   : > { %2220 = vmatpush3.bf16.msra.mxu0 %v3155_v6  ;;  %2146 = vmatprep.mubr.msk.f32.mxu0 %vm2736_vm2, %v2737_v8 }
 0x82e   : > { %2221 = vmatprep.subr.bf16.mxu0 %v2735_v5 }
 0x831   : > { %2223 = vmatpush3.bf16.msra.mxu0 %v3164_v9 }
 0x832   : > { %2230 = vmatprep.subr.bf16.mxu0 %v2735_v5 }
 0x8ff   : > { %v1122_v46 = vpop.f32.mrb[2].mxu0 }
 0x900   : > { %v1126_v47 = vadd.f32 %v1122_v46, %v1053_v45  ;;  %v2126_v48 = vpop.f32.mrb[3].mxu0  ;;  %v1457_v45 = vld [vmem:[#allocation2 + $0x30] sm:$0xff] }
 0x902   : > { %2371 = vtanh.f32 %v1126_v47 }
 0x90c   : > { %v2372_v49 = vpop.eup %2371 }
 0x90d   : > { %1132 = vrot.lane.b32.xlu1 %v2372_v49, %s2738_s1  ;;  %v1128_v50 = vmul.f32 0.5, %v2372_v49 }
 0x90f   : > { %v1129_v51 = vadd.f32 0.5, %v1128_v50 }
 0x911   : > { %v1130_v54 = vmul.f32 %v1129_v51, %v1039_v40 }
 0x97f   : > { %v1133_v52 = vpop.permute.xlu1 %1132 }
 0x980   : > { %v1135_v53 = vmul.f32 %v1133_v52, %v1129_v51 }
 0x982   : > { %1137 = vrot.lane.b32.xlu0 %v1135_v53, %s2739_s29 }
 0x9f4   : > { %v1138_v55 = vpop.permute.xlu0 %1137 }
 0x9f5   : > { %v1140_v56 = vadd.f32 %v1138_v55, %v1130_v54 }
 0x9f7   : > { %2373 = vtanh.f32 %v1140_v56 }
 0xa01   : > { %v2374_v57 = vpop.eup %2373 }
 0xa02   : > { %1143 = vrot.lane.b32.xlu1 %v2374_v57, %s2738_s1 }
 0xa74   : > { %v1144_v58 = vpop.permute.xlu1 %1143 }
 0xa75   : > { %v1146_v59 = vmul.f32 %v1144_v58, %v1129_v51 }
 0xa77   : > { %1148 = vrot.lane.b32.xlu0 %v1146_v59, %s2739_s29 }
 0xae9   : > { %v1149_v60 = vpop.permute.xlu0 %1148 }
 0xaea   : > { %1152 = vst.msk [vmem:[#allocation14 + $0x10] sm:$0xff] %vm847_vm3, %v1149_v60  ;;  %2136 = vmatmul.mubr.msk.f32.vlgmr.msra.gmra.mrb[2].mxu1 %vm847_vm3, %v1149_v60 }
 0xaeb   : > { %2226 = vmatpush3.bf16.msra.mxu1 %v3155_v6  ;;  %2157 = vmatprep.mubr.msk.f32.mxu1 %vm2736_vm2, %v2737_v8 }
 0xaec   : > { %2227 = vmatprep.subr.bf16.mxu1 %v2735_v5 }
 0xaef   : > { %2229 = vmatpush3.bf16.msra.mxu1 %v3164_v9 }
 0xaf0   : > { %2236 = vmatprep.subr.bf16.mxu1 %v2735_v5 }
 0xbbd   : > { %v1223_v62 = vpop.f32.mrb[2].mxu1 }
 0xbbe   : > { %v1227_v63 = vadd.f32 %v1223_v62, %v1154_v61  ;;  %v2137_v1 = vpop.f32.mrb[3].mxu1  ;;  %v1558_v61 = vld [vmem:[#allocation2 + $0x38] sm:$0xff] }
 0xbc0   : > { %2375 = vtanh.f32 %v1227_v63 }
 0xbca   : > { %v2376_v0 = vpop.eup %2375 }
 0xbcb   : > { %1233 = vrot.lane.b32.xlu1 %v2376_v0, %s2738_s1  ;;  %v1229_v2 = vmul.f32 0.5, %v2376_v0 }
 0xbcd   : > { %v1230_v3 = vadd.f32 0.5, %v1229_v2 }
 0xbcf   : > { %v1231_v10 = vmul.f32 %v1230_v3, %v1140_v56 }
 0xc3d   : > { %v1234_v4 = vpop.permute.xlu1 %1233 }
 0xc3e   : > { %v1236_v7 = vmul.f32 %v1234_v4, %v1230_v3 }
 0xc40   : > { %1238 = vrot.lane.b32.xlu0 %v1236_v7, %s2739_s29 }
 0xcb2   : > { %v1239_v11 = vpop.permute.xlu0 %1238 }
 0xcb3   : > { %v1241_v12 = vadd.f32 %v1239_v11, %v1231_v10 }
 0xcb5   : > { %2377 = vtanh.f32 %v1241_v12 }
 0xcbf   : > { %v2378_v13 = vpop.eup %2377 }
 0xcc0   : > { %1244 = vrot.lane.b32.xlu1 %v2378_v13, %s2738_s1 }
 0xd32   : > { %v1245_v14 = vpop.permute.xlu1 %1244 }
 0xd33   : > { %v1247_v15 = vmul.f32 %v1245_v14, %v1230_v3 }
 0xd35   : > { %1249 = vrot.lane.b32.xlu0 %v1247_v15, %s2739_s29 }
 0xda7   : > { %v1250_v16 = vpop.permute.xlu0 %1249 }
 0xda8   : > { %1253 = vst.msk [vmem:[#allocation14 + $0x18] sm:$0xff] %vm847_vm3, %v1250_v16  ;;  %2147 = vmatmul.mubr.msk.f32.vlgmr.msra.gmra.mrb[4].mxu0 %vm847_vm3, %v1250_v16 }
 0xda9   : > { %2232 = vmatpush3.bf16.msra.mxu0 %v3155_v6  ;;  %2168 = vmatprep.mubr.msk.f32.mxu0 %vm2736_vm2, %v2737_v8 }
 0xdaa   : > { %2233 = vmatprep.subr.bf16.mxu0 %v2735_v5 }
 0xdad   : > { %2235 = vmatpush3.bf16.msra.mxu0 %v3164_v9 }
 0xe7b   : > { %v1324_v18 = vpop.f32.mrb[4].mxu0 }
 0xe7c   : > { %v1328_v19 = vadd.f32 %v1324_v18, %v1255_v17  ;;  %v2148_v20 = vpop.f32.mrb[5].mxu0 }
 0xe7e   : > { %2379 = vtanh.f32 %v1328_v19 }
 0xe88   : > { %v2380_v21 = vpop.eup %2379 }
 0xe89   : > { %1334 = vrot.lane.b32.xlu1 %v2380_v21, %s2738_s1  ;;  %v1330_v22 = vmul.f32 0.5, %v2380_v21 }
 0xe8b   : > { %v1331_v23 = vadd.f32 0.5, %v1330_v22 }
 0xe8d   : > { %v1332_v26 = vmul.f32 %v1331_v23, %v1241_v12 }
 0xefb   : > { %v1335_v24 = vpop.permute.xlu1 %1334 }
 0xefc   : > { %v1337_v25 = vmul.f32 %v1335_v24, %v1331_v23 }
 0xefe   : > { %1339 = vrot.lane.b32.xlu0 %v1337_v25, %s2739_s29 }
 0xf70   : > { %v1340_v27 = vpop.permute.xlu0 %1339 }
 0xf71   : > { %v1342_v28 = vadd.f32 %v1340_v27, %v1332_v26 }
 0xf73   : > { %2381 = vtanh.f32 %v1342_v28 }
 0xf7d   : > { %v2382_v29 = vpop.eup %2381 }
 0xf7e   : > { %1345 = vrot.lane.b32.xlu1 %v2382_v29, %s2738_s1 }
 0xff0   : > { %v1346_v30 = vpop.permute.xlu1 %1345 }
 0xff1   : > { %v1348_v31 = vmul.f32 %v1346_v30, %v1331_v23 }
 0xff3   : > { %1350 = vrot.lane.b32.xlu0 %v1348_v31, %s2739_s29 }
0x1065   : > { %v1351_v32 = vpop.permute.xlu0 %1350 }
0x1066   : > { %1354 = vst.msk [vmem:[#allocation14 + $0x20] sm:$0xff] %vm847_vm3, %v1351_v32  ;;  %2158 = vmatmul.mubr.msk.f32.vlgmr.msra.gmra.mrb[4].mxu1 %vm847_vm3, %v1351_v32 }
0x1067   : > { %2238 = vmatpush3.bf16.msra.mxu1 %v3155_v6  ;;  %2179 = vmatprep.mubr.msk.f32.mxu1 %vm2736_vm2, %v2737_v8 }
0x1068   : > { %2239 = vmatprep.subr.bf16.mxu1 %v2735_v5 }
0x106b   : > { %2241 = vmatpush3.bf16.msra.mxu1 %v3164_v9 }
0x1139   : > { %v1425_v34 = vpop.f32.mrb[4].mxu1 }
0x113a   : > { %v1429_v35 = vadd.f32 %v1425_v34, %v1356_v33  ;;  %v2159_v36 = vpop.f32.mrb[5].mxu1 }
0x113c   : > { %2383 = vtanh.f32 %v1429_v35 }
0x1146   : > { %v2384_v37 = vpop.eup %2383 }
0x1147   : > { %1435 = vrot.lane.b32.xlu1 %v2384_v37, %s2738_s1  ;;  %v1431_v38 = vmul.f32 0.5, %v2384_v37 }
0x1149   : > { %v1432_v39 = vadd.f32 0.5, %v1431_v38 }
0x114b   : > { %v1433_v6 = vmul.f32 %v1432_v39, %v1342_v28 }
0x11b9   : > { %v1436_v40 = vpop.permute.xlu1 %1435 }
0x11ba   : > { %v1438_v41 = vmul.f32 %v1436_v40, %v1432_v39 }
0x11bc   : > { %1440 = vrot.lane.b32.xlu0 %v1438_v41, %s2739_s29 }
0x122e   : > { %v1441_v8 = vpop.permute.xlu0 %1440 }
0x122f   : > { %v1443_v42 = vadd.f32 %v1441_v8, %v1433_v6 }
0x1231   : > { %2385 = vtanh.f32 %v1443_v42 }
0x123b   : > { %v2386_v5 = vpop.eup %2385 }
0x123c   : > { %1446 = vrot.lane.b32.xlu1 %v2386_v5, %s2738_s1 }
0x12ae   : > { %v1447_v9 = vpop.permute.xlu1 %1446 }
0x12af   : > { %v1449_v43 = vmul.f32 %v1447_v9, %v1432_v39 }
0x12b1   : > { %1451 = vrot.lane.b32.xlu0 %v1449_v43, %s2739_s29 }
0x1323   : > { %v1452_v44 = vpop.permute.xlu0 %1451 }
0x1324   : > { %1455 = vst.msk [vmem:[#allocation14 + $0x28] sm:$0xff] %vm847_vm3, %v1452_v44  ;;  %2169 = vmatmul.mubr.msk.f32.vlgmr.msra.gmra.mrb[6].mxu0 %vm847_vm3, %v1452_v44 }
0x13f7   : > { %v1526_v46 = vpop.f32.mrb[6].mxu0 }
0x13f8   : > { %v1530_v47 = vadd.f32 %v1526_v46, %v1457_v45  ;;  %v2170_v48 = vpop.f32.mrb[7].mxu0 }
0x13fa   : > { %2387 = vtanh.f32 %v1530_v47 }
0x1404   : > { %v2388_v49 = vpop.eup %2387 }
0x1405   : > { %1536 = vrot.lane.b32.xlu1 %v2388_v49, %s2738_s1  ;;  %v1532_v50 = vmul.f32 0.5, %v2388_v49 }
0x1407   : > { %v1533_v51 = vadd.f32 0.5, %v1532_v50 }
0x1409   : > { %v1534_v54 = vmul.f32 %v1533_v51, %v1443_v42 }
0x1477   : > { %v1537_v52 = vpop.permute.xlu1 %1536 }
0x1478   : > { %v1539_v53 = vmul.f32 %v1537_v52, %v1533_v51 }
0x147a   : > { %1541 = vrot.lane.b32.xlu0 %v1539_v53, %s2739_s29 }
0x14ec   : > { %v1542_v55 = vpop.permute.xlu0 %1541 }
0x14ed   : > { %v1544_v56 = vadd.f32 %v1542_v55, %v1534_v54 }
0x14ef   : > { %2389 = vtanh.f32 %v1544_v56 }
0x14f9   : > { %v2390_v57 = vpop.eup %2389 }
0x14fa   : > { %1547 = vrot.lane.b32.xlu1 %v2390_v57, %s2738_s1 }
0x156c   : > { %v1548_v58 = vpop.permute.xlu1 %1547 }
0x156d   : > { %v1550_v59 = vmul.f32 %v1548_v58, %v1533_v51 }
0x156f   : > { %1552 = vrot.lane.b32.xlu0 %v1550_v59, %s2739_s29 }
0x15e1   : > { %v1553_v60 = vpop.permute.xlu0 %1552 }
0x15e2   : > { %1556 = vst.msk [vmem:[#allocation14 + $0x30] sm:$0xff] %vm847_vm3, %v1553_v60  ;;  %2180 = vmatmul.mubr.msk.f32.vlgmr.msra.gmra.mrb[6].mxu1 %vm847_vm3, %v1553_v60 }
0x16b5   : > { %v1627_v62 = vpop.f32.mrb[6].mxu1 }
0x16b6   : > { %v1631_v63 = vadd.f32 %v1627_v62, %v1558_v61  ;;  %v2181_v1 = vpop.f32.mrb[7].mxu1 }
0x16b8   : > { %2391 = vtanh.f32 %v1631_v63 }
0x16c2   : > { %v2392_v0 = vpop.eup %2391 }
0x16c3   : > { %1637 = vrot.lane.b32.xlu1 %v2392_v0, %s2738_s1  ;;  %v1633_v2 = vmul.f32 0.5, %v2392_v0 }
0x16c5   : > { %v1634_v3 = vadd.f32 0.5, %v1633_v2 }
0x16c7   : > { %v1635_v10 = vmul.f32 %v1634_v3, %v1544_v56 }
0x1735   : > { %v1638_v4 = vpop.permute.xlu1 %1637 }
0x1736   : > { %v1640_v7 = vmul.f32 %v1638_v4, %v1634_v3 }
0x1738   : > { %1642 = vrot.lane.b32.xlu0 %v1640_v7, %s2739_s29 }
0x17aa   : > { %v1643_v11 = vpop.permute.xlu0 %1642 }
0x17ab   : > { %v1645_v12 = vadd.f32 %v1643_v11, %v1635_v10 }
0x17ad   : > { %2393 = vtanh.f32 %v1645_v12 }
0x17b7   : > { %v2394_v13 = vpop.eup %2393 }
0x17b8   : > { %1648 = vrot.lane.b32.xlu1 %v2394_v13, %s2738_s1 }
0x17bc   : > { %1660 = vrot.lane.b32.xlu1 %v1645_v12, %s2740_s10 }
0x182a   : > { %v1649_v14 = vpop.permute.xlu1 %1648 }
0x182b   : > { %v1651_v15 = vmul.f32 %v1649_v14, %v1634_v3 }
0x182d   : > { %1653 = vrot.lane.b32.xlu0 %v1651_v15, %s2739_s29 }
0x182e   : > { %v1661_v16 = vpop.permute.xlu1 %1660 }
0x182f   : > { %1663 = vst.msk [vmem:[%s520_s26] sm:$0xff] %vm847_vm3, %v1661_v16  ;;  %s2577_s26 = sshll.u32 %s2742_s14, 4  ;;  %s2578_s26 = int_to_ptr.vmem [resolvable:$false] %s2577_s26 }
0x1830   : > { %s2579_s1 = scalar_lea.vmem %s2578_s26, 256  ;;  %p2580_p9 = scmp.lt.s32.totalorder %s3272_s8, %s2578_s26 }
0x1831   : > { %p2581_p5 = scmp.lt.s32.totalorder %s2579_s1, %s2573_s25 }
0x1833   : > { %p2582_p1 = por %p2581_p5, %p2580_p9 }
0x1835   : > { %p2583_p11 = pnand %p2582_p1, %p2576_p12 }
0x189f   : > { %v1654_v17 = vpop.permute.xlu0 %1653 }
0x18a0   : > { %1657 = vst.msk [vmem:[#allocation14 + $0x38] sm:$0xff] %vm847_vm3, %v1654_v17  ;;  %1658 = vst.msk [vmem:[%s513_s13] sm:$0xff] %vm847_vm3, %v1654_v17 }
0x18a1   : > { %2586 = shalt.err (!%p2583_p11)
}
0x18a2   : > { %s2587_s19 = scalar_lea.hbm %s3268_s23, 128  ;;  %s2591_s10 = scalar_lea.hbm %s3392_s7, 256 }
0x18a3   : > { %p2588_p0 = scmp.ne.s32.totalorder %s3268_s23, %s2587_s19  ;;  %p2592_p3 = scmp.lt.u32.totalorder %s3268_s23, %s3392_s7 }
0x18a4   : > { %p2593_p4 = scmp.lt.u32.totalorder %s2591_s10, %s2587_s19  ;;  %p2595_p7 = scmp.lt.u32.totalorder %s2587_s19, %s3268_s23 }
0x18a5   : > { %p2589_p6 = pnand %p2588_p0, %p3458_p8 }
0x18a6   : > { %p2594_p13 = por %p2593_p4, %p2592_p3 }
0x18a7   : > { %p2590_p10 = pneg %p2589_p6 }
0x18a8   : > { %p2596_p2 = por %p2595_p7, %p2594_p13 }
0x18aa   : > { %p2597_p12 = pnand %p2596_p2, %p2590_p10 }
0x18ac   : > { %2600 = shalt.err (!%p2597_p12)
}
0x18ad   : > { %2264 = dma.vmem_to_hbm [thread:$0]  (%p3458_p8), %s3272_s8, 128, %s3268_s23, %s1665_s24  }
0x18ae   : > { %s2601_s18 = scalar_lea.vmem %s3274_s16, 1024  ;;  %p3459_p5 = scmp.eq.s32.totalorder %s2948_s11, 1 }
0x18af   : > { %p2602_p9 = scmp.ne.s32.totalorder %s3274_s16, %s2601_s18  ;;  %p2608_p0 = scmp.lt.s32.totalorder %s3274_s16, %s3274_s16 }
0x18b0   : > { %p2609_p6 = scmp.lt.s32.totalorder %s2601_s18, %s2601_s18 }
0x18b1   : > { %p2603_p1 = pnand %p2602_p9, %p3459_p5 }
0x18b2   : > { %p2610_p10 = por %p2609_p6, %p2608_p0 }
0x18b3   : > { %p2604_p11 = pneg %p2603_p1 }
0x18b5   : > { %p2611_p3 = pnand %p2610_p10, %p2604_p11 }
0x18b7   : > { %2614 = shalt.err (!%p2611_p3)
}
0x18b8   : > { %s3460_s27 = sld [smem:[#allocation31_spill]]  ;;  %p3462_p13 = pmov %p3459_p5 }
0x18be   : > { %s3461_s25 = smov %s3460_s27  ;;  %s2615_s14 = scalar_lea.hbm %s3460_s27, 1024 }
0x18bf   : > { %p2616_p4 = scmp.ne.s32.totalorder %s3461_s25, %s2615_s14  ;;  %p2621_p12 = scmp.lt.u32.totalorder %s2615_s14, %s3461_s25 }
0x18c1   : > { %p2617_p7 = pnand %p2616_p4, %p3462_p13 }
0x18c3   : > { %p2618_p2 = pneg %p2617_p7 }
0x18c5   : > { %p2623_p9 = pnand %p2621_p12, %p2618_p2 }
0x18c7   : > { %2626 = shalt.err (!%p2623_p9)
}
0x18c8   : > { %s2743_s19 = smov 128   ;;  %s2744_s13 = smov 8  }
0x18c9   : > { %2263 = dma.vmem_to_hbm [thread:$0]  (%p3459_p5), %s3274_s16, 1024, %s3461_s25, [#allocation5], %s2743_s19, %s2743_s19, %s2744_s13  }
0x18ca   : > { %s2627_s15 = scalar_lea.vmem %s3285_s20, 128  ;;  %s2745_s17 = smov [#allocation17]  }
0x18cb   : > { %p2628_p1 = scmp.ne.s32.totalorder %s3285_s20, %s2627_s15  ;;  %s2631_s18 = sshll.u32 %s2745_s17, 4  ;;  %s2632_s18 = int_to_ptr.vmem [resolvable:$false] %s2631_s18 }
0x18cc   : > { %s2633_s22 = scalar_lea.vmem %s2632_s18, 256  ;;  %p2634_p6 = scmp.lt.s32.totalorder %s3285_s20, %s2632_s18 }
0x18cd   : > { %p2629_p11 = pnand %p2628_p1, %p3458_p8  ;;  %p2635_p10 = scmp.lt.s32.totalorder %s2633_s22, %s2627_s15 }
0x18cf   : > { %p2630_p0 = pneg %p2629_p11  ;;  %p2636_p3 = por %p2635_p10, %p2634_p6 }
0x18d1   : > { %p2637_p4 = pnand %p2636_p3, %p2630_p0 }
0x18d3   : > { %2640 = shalt.err (!%p2637_p4)
}
0x18d4   : > { %s2641_s16 = scalar_lea.hbm %s3283_s6, 128  ;;  %s2645_s14 = scalar_lea.hbm %s3457_s3, 256 }
0x18d5   : > { %p2642_p13 = scmp.ne.s32.totalorder %s3283_s6, %s2641_s16  ;;  %p2646_p12 = scmp.lt.u32.totalorder %s3283_s6, %s3457_s3 }
0x18d6   : > { %p2647_p9 = scmp.lt.u32.totalorder %s2645_s14, %s2641_s16  ;;  %p2649_p1 = scmp.lt.u32.totalorder %s2641_s16, %s3283_s6 }
0x18d7   : > { %p2643_p7 = pnand %p2642_p13, %p3458_p8 }
0x18d8   : > { %p2648_p5 = por %p2647_p9, %p2646_p12 }
0x18d9   : > { %p2644_p2 = pneg %p2643_p7 }
0x18da   : > { %p2650_p11 = por %p2649_p1, %p2648_p5 }
0x18dc   : > { %p2651_p0 = pnand %p2650_p11, %p2644_p2 }
0x18de   : > { %2654 = shalt.err (!%p2651_p0)
}
0x18df   : > { %2265 = dma.vmem_to_hbm [thread:$0]  (%p3458_p8), %s3285_s20, 128, %s3283_s6, %s1665_s24  }
0x18e0   : > { %p3463_p6 = scmp.eq.s32.totalorder %s2948_s11, 1 }
0x18e2   : > { %2696 = dma.done.wait (%p3463_p6), [#allocation5], 1024   ;;  %p3464_p10 = pmov %p3463_p6 }
0x18e4   : > { %2698 = vsyncadd (%p3464_p10), [#allocation5], 4294966272 }
0x18e5 PF: > { %s3465_s8 = sld [smem:[#allocation25_spill]]  ;;  %s3467_s19 = sld [smem:[#allocation28_spill]] }
0x18eb   : > { %s3466_s23 = sadd.s32 4294967294, %s3465_s8   ;;  %p3468_p3 = scmp.ne.s32.totalorder %s3467_s19, 0 }
0x18ec   : > { %s1729_s13 = sand.u32 1, %s3466_s23   ;;  %p3469_p4 = scmp.ge.s32.totalorder %s3465_s8, 2 }
0x18ed   : > { %s1730_s21 = scalar_lea.sflag [#allocation16], %s1729_s13 }
0x18ee   : > { %p2291_p13 = pnand %p3469_p4, %p3468_p3 }
0x18f0   : > { %2700 = dma.done.wait (!%p2291_p13), %s1730_s21, 256  }
0x18f1   : > { %2702 = vsyncadd (!%p2291_p13), %s1730_s21, 4294967040  ;;  %s33_s10 = sadd.s32 1, %s3465_s8   ;;  %s3470_s12 = sld [smem:[#allocation24_spill]] }
0x18f2   : > { %p30_p8 = scmp.ge.s32.totalorder %s33_s10, 4   ;;  %s3471_s29 = sld [smem:[#allocation27_spill]] }
0x18f3   : > { %s3472_s11 = sld [smem:[#allocation26_spill]]  ;;  %s3473_s27 = smov %s2709_s28 }
0x18f4   : > { %s3475_s30 = smov %s2721_s9  ;;  %32 = sbr.rel (!%p30_p8) target bundleno = 17 (0x11), region = 190 }
0x18f7   : > { %s3474_s28 = smov %s3470_s12 }
0x18f9   : > { %s3476_s9 = smov %s3472_s11 }
0x18fb   :  { %1744 = vsyncpa [#allocation4], 1 }
0x18fc   :  { %1746 = vsyncpa [#allocation4 + $0x1], 1 }
0x18fd   :  { %1747 = vsyncpa [#allocation7], 1 }
0x18fe   :  { %1749 = vsyncpa [#allocation7 + $0x1], 1 }
0x18ff   :  { %1750 = vsyncpa [#allocation10], 1 }
0x1900   :  { %1752 = vsyncpa [#allocation10 + $0x1], 1 }
0x1901   :  { %1753 = vsyncpa [#allocation13], 1 }
0x1902   :  { %1755 = vsyncpa [#allocation13 + $0x1], 1 }
0x1903   :  { %1756 = vsyncpa [#allocation5], 1 }
0x1904   :  { %1758 = vsyncpa [#allocation5 + $0x1], 1 }
0x1905   :  { %1759 = vsyncpa [#allocation16], 1 }
0x1906   :  { %1761 = vsyncpa [#allocation16 + $0x1], 1 }

</bundles_post_ra>
